<compile_context>
chip_gen: v7x
topology: tpu7x:2x2x1
jax: 0.10.0
libtpu: 0.0.40
codegen_flags: <defaults>
</compile_context>

<pallas_src>
import jax
import jax.numpy as jnp
from jax.experimental import pallas as pl
from jax.experimental.pallas import tpu as pltpu

# ----------------------------- small ViT config -----------------------------
PATCH = 16          # patch size (matches iBOT vit_small patch_size=16)
IN_CH = 3           # RGB
EMBED = 128         # embedding dim (small, lane-aligned)
HEADS = 4
HEAD_DIM = EMBED // HEADS
MLP_HIDDEN = 256
DEPTH = 2           # number of transformer blocks
LN_EPS = 1e-6       # timm/DINO ViT LayerNorm eps
VEC_W = 3 * EMBED   # lane width of the packed per-block vector table


# ----------------------------- Pallas kernels -------------------------------
def embed_kernel(p_ref, w_ref, b_ref, cls_ref, pos_ref, o_ref):
    """Patch-embed (Conv2d stride=16 as matmul) fused with cls-concat + pos-add.

    p_ref: (1, num_patches, C*16*16) bf16 patches for one batch element
    o_ref: (1, N, D) f32 tokens (cls + patches, pos-embedded)
    """
    emb = (jnp.dot(p_ref[0], w_ref[...], preferred_element_type=jnp.float32)
           + b_ref[...])                                  # (P, D) f32
    tok = jnp.concatenate([cls_ref[...], emb], axis=0)    # (N, D)
    o_ref[0] = tok + pos_ref[...]


def _layernorm(v, g, b):
    mu = jnp.mean(v, axis=-1, keepdims=True)
    var = jnp.mean((v - mu) ** 2, axis=-1, keepdims=True)
    return (v - mu) * jax.lax.rsqrt(var + LN_EPS) * g + b


def block_kernel(x_ref, qkvw, projw, fc1w, fc2w, vec_ref, xo_ref):
    """One full ViT block (attention + MLP) for a single batch element.

    No attention output is emitted -- only the last block's attention is
    consumed downstream, and that is handled by `last_attn_kernel`.

    Packed vector table vec_ref (8, 3*EMBED) f32, rows:
      0 ln1_g | 1 ln1_b | 2 qkv_b(3D) | 3 proj_b | 4 ln2_g | 5 ln2_b
      6 fc1_b(MLP_HIDDEN) | 7 fc2_b
    """
    x = x_ref[0]                                   # (N, D) f32
    vec = vec_ref[...]
    ln1_g = vec[0:1, :EMBED]
    ln1_b = vec[1:2, :EMBED]
    qkv_b = vec[2:3, :]
    proj_b = vec[3:4, :EMBED]
    ln2_g = vec[4:5, :EMBED]
    ln2_b = vec[5:6, :EMBED]
    fc1_b = vec[6:7, :MLP_HIDDEN]
    fc2_b = vec[7:8, :EMBED]

    # ---- Attention: x + proj(softmax(q k^T / sqrt(d)) v) ----
    h = _layernorm(x, ln1_g, ln1_b)
    qkv = (jnp.dot(h.astype(jnp.bfloat16), qkvw[...],
                   preferred_element_type=jnp.float32) + qkv_b)   # (N, 3D) f32
    scale = HEAD_DIM ** -0.5

    ctx_heads = []
    for hh in range(HEADS):                        # static unroll over heads
        q_h = qkv[:, hh * HEAD_DIM:(hh + 1) * HEAD_DIM]
        k_h = qkv[:, EMBED + hh * HEAD_DIM:EMBED + (hh + 1) * HEAD_DIM]
        v_h = qkv[:, 2 * EMBED + hh * HEAD_DIM:2 * EMBED + (hh + 1) * HEAD_DIM]
        s = jax.lax.dot_general(q_h, k_h, (((1,), (1,)), ((), ())),
                                preferred_element_type=jnp.float32) * scale
        s = s - jnp.max(s, axis=-1, keepdims=True)
        e = jnp.exp(s)
        p = e * pl.reciprocal(jnp.sum(e, axis=-1, keepdims=True), approx=True)
        ctx_heads.append(jnp.dot(p.astype(jnp.bfloat16), v_h.astype(jnp.bfloat16),
                                 preferred_element_type=jnp.float32))
    ctx = jnp.concatenate(ctx_heads, axis=-1)      # (N, D)
    attn_out = (jnp.dot(ctx.astype(jnp.bfloat16), projw[...],
                        preferred_element_type=jnp.float32) + proj_b)
    x = x + attn_out

    # ---- MLP: x + fc2(gelu(fc1(ln2(x)))) ----
    h2 = _layernorm(x, ln2_g, ln2_b)
    h2 = (jnp.dot(h2.astype(jnp.bfloat16), fc1w[...],
                  preferred_element_type=jnp.float32) + fc1_b)
    # TODO(synk): PyTorch nn.GELU uses exact erf; tanh approximation used here.
    h2 = jax.nn.gelu(h2, approximate=True)
    h2 = (jnp.dot(h2.astype(jnp.bfloat16), fc2w[...],
                  preferred_element_type=jnp.float32) + fc2_b)
    xo_ref[0] = x + h2


def last_attn_kernel(x_ref, qkw, vec_ref, attn_ref):
    """Last block of get_last_selfattention: only the post-softmax CLS row.

    softmax(q_cls K^T / sqrt(d)) per head.  No V/proj/MLP: the last block's
    token output is never consumed by the reference forward.

    attn_ref: (1, HEADS, N) CLS attention rows.
    """
    x = x_ref[0]                                   # (N, D)
    vec = vec_ref[...]
    ln1_g = vec[0:1, :EMBED]
    ln1_b = vec[1:2, :EMBED]
    qk_b = vec[2:3, :2 * EMBED]

    h = _layernorm(x, ln1_g, ln1_b)
    qk = (jnp.dot(h.astype(jnp.bfloat16), qkw[...],
                  preferred_element_type=jnp.float32) + qk_b)     # (N, 2D)
    scale = HEAD_DIM ** -0.5

    rows = []
    for hh in range(HEADS):
        q_cls = qk[0:1, hh * HEAD_DIM:(hh + 1) * HEAD_DIM]          # (1, hd)
        k_h = qk[:, EMBED + hh * HEAD_DIM:EMBED + (hh + 1) * HEAD_DIM]  # (N, hd)
        s = jax.lax.dot_general(q_cls, k_h, (((1,), (1,)), ((), ())),
                                preferred_element_type=jnp.float32) * scale
        s = s - jnp.max(s, axis=-1, keepdims=True)
        e = jnp.exp(s)
        rows.append(e * pl.reciprocal(jnp.sum(e, axis=-1, keepdims=True),
                                      approx=True))
    attn_ref[0] = jnp.concatenate(rows, axis=0)    # (HEADS, N)


# ----------------------------- pallas_call wrappers --------------------------
def embed_tokens(patches, params):
    """patches: (B, P, C*16*16) bf16 -> tokens (B, P+1, D) f32 (cls + pos fused)."""
    B, P, K = patches.shape
    N = P + 1
    return pl.pallas_call(
        embed_kernel,
        grid=(B,),
        in_specs=[
            pl.BlockSpec((1, P, K), lambda b: (b, 0, 0)),
            pl.BlockSpec((K, EMBED), lambda b: (0, 0)),
            pl.BlockSpec((1, EMBED), lambda b: (0, 0)),
            pl.BlockSpec((1, EMBED), lambda b: (0, 0)),
            pl.BlockSpec((N, EMBED), lambda b: (0, 0)),
        ],
        out_specs=pl.BlockSpec((1, N, EMBED), lambda b: (b, 0, 0)),
        out_shape=jax.ShapeDtypeStruct((B, N, EMBED), jnp.float32),
        compiler_params=pltpu.CompilerParams(
            dimension_semantics=("parallel",)),
    )(patches, params["patch_w"], params["patch_b"], params["cls"],
      params["pos"])


def run_block(tok, blk):
    """Full ViT block; tokens in, tokens out.  No attention output emitted."""
    B, N, D = tok.shape
    return pl.pallas_call(
        block_kernel,
        grid=(B,),
        in_specs=[
            pl.BlockSpec((1, N, D), lambda b: (b, 0, 0)),
            pl.BlockSpec(blk["qkv_w"].shape, lambda b: (0, 0)),
            pl.BlockSpec(blk["proj_w"].shape, lambda b: (0, 0)),
            pl.BlockSpec(blk["fc1_w"].shape, lambda b: (0, 0)),
            pl.BlockSpec(blk["fc2_w"].shape, lambda b: (0, 0)),
            pl.BlockSpec(blk["vecs"].shape, lambda b: (0, 0)),
        ],
        out_specs=pl.BlockSpec((1, N, D), lambda b: (b, 0, 0)),
        out_shape=jax.ShapeDtypeStruct((B, N, D), jnp.float32),
        compiler_params=pltpu.CompilerParams(
            dimension_semantics=("parallel",)),
    )(tok, blk["qkv_w"], blk["proj_w"], blk["fc1_w"], blk["fc2_w"], blk["vecs"])


def run_last_block(tok, blk):
    """Last block: returns only the CLS attention rows (B, HEADS, N)."""
    B, N, D = tok.shape
    qk_w = blk["qkv_w"][:, :2 * EMBED]   # only Q and K weights are needed
    return pl.pallas_call(
        last_attn_kernel,
        grid=(B,),
        in_specs=[
            pl.BlockSpec((1, N, D), lambda b: (b, 0, 0)),
            pl.BlockSpec(qk_w.shape, lambda b: (0, 0)),
            pl.BlockSpec(blk["vecs"].shape, lambda b: (0, 0)),
        ],
        out_specs=pl.BlockSpec((1, HEADS, N), lambda b: (b, 0, 0)),
        out_shape=jax.ShapeDtypeStruct((B, HEADS, N), jnp.float32),
        compiler_params=pltpu.CompilerParams(
            dimension_semantics=("parallel",)),
    )(tok, qk_w, blk["vecs"])


# ----------------------------- parameters ------------------------------------
def _pad_to(v, width):
    return jnp.pad(v, ((0, 0), (0, width - v.shape[1])))


def _init_block(key):
    kk = jax.random.split(key, 8)
    s = 0.02
    f32, bf16 = jnp.float32, jnp.bfloat16
    qkv_w = (s * jax.random.normal(kk[0], (EMBED, 3 * EMBED), f32)).astype(bf16)
    proj_w = (s * jax.random.normal(kk[1], (EMBED, EMBED), f32)).astype(bf16)
    fc1_w = (s * jax.random.normal(kk[2], (EMBED, MLP_HIDDEN), f32)).astype(bf16)
    fc2_w = (s * jax.random.normal(kk[3], (MLP_HIDDEN, EMBED), f32)).astype(bf16)

    ln1_g = jnp.ones((1, EMBED), f32)
    ln1_b = jnp.zeros((1, EMBED), f32)
    qkv_b = s * jax.random.normal(kk[4], (1, 3 * EMBED), f32)
    proj_b = s * jax.random.normal(kk[5], (1, EMBED), f32)
    ln2_g = jnp.ones((1, EMBED), f32)
    ln2_b = jnp.zeros((1, EMBED), f32)
    fc1_b = s * jax.random.normal(kk[6], (1, MLP_HIDDEN), f32)
    fc2_b = s * jax.random.normal(kk[7], (1, EMBED), f32)

    # Pack the 12 small vectors into one (8, 3*EMBED) table (one DMA, one
    # padded VMEM buffer instead of 8).
    vecs = jnp.concatenate(
        [_pad_to(ln1_g, VEC_W), _pad_to(ln1_b, VEC_W), qkv_b,
         _pad_to(proj_b, VEC_W), _pad_to(ln2_g, VEC_W), _pad_to(ln2_b, VEC_W),
         _pad_to(fc1_b, VEC_W), _pad_to(fc2_b, VEC_W)], axis=0)

    return dict(qkv_w=qkv_w, proj_w=proj_w, fc1_w=fc1_w, fc2_w=fc2_w, vecs=vecs)


def init_params(key, num_patches):
    ks = jax.random.split(key, 4 + DEPTH)
    f32, bf16 = jnp.float32, jnp.bfloat16
    return {
        # Conv2d(3, D, kernel=16, stride=16) weight flattened (C, ph, pw) -> K
        "patch_w": (0.02 * jax.random.normal(
            ks[0], (IN_CH * PATCH * PATCH, EMBED), f32)).astype(bf16),
        "patch_b": 0.02 * jax.random.normal(ks[1], (1, EMBED), f32),
        "cls": 0.02 * jax.random.normal(ks[2], (1, EMBED), f32),
        "pos": 0.02 * jax.random.normal(ks[3], (num_patches + 1, EMBED), f32),
        "blocks": [_init_block(ks[4 + i]) for i in range(DEPTH)],
    }


# ----------------------------- iBOT forward ----------------------------------
def ibot_forward(params, x, interpolate=False):
    """x: (B, C, H, W) NCHW.  Returns (B, HEADS, H//16, W//16) CLS attention."""
    B, C, Himg, Wimg = x.shape
    w_featmap = Himg // PATCH
    h_featmap = Wimg // PATCH
    num_patches = w_featmap * h_featmap

    # --- patchify (glue): NCHW -> (B, P, C*16*16), same flatten order as Conv2d
    p = x.reshape(B, C, w_featmap, PATCH, h_featmap, PATCH)
    p = p.transpose(0, 2, 4, 1, 3, 5).reshape(
        B, num_patches, C * PATCH * PATCH).astype(jnp.bfloat16)

    # --- patch embedding + cls token + positional embedding (fused kernel)
    # TODO(synk): iBOT's interpolate_pos_encoding is not implemented; the image
    # size must match the size used at init.
    tok = embed_tokens(p, params)                      # (B, N, D) f32

    # --- transformer blocks; only the LAST block's CLS attention is computed
    for blk in params["blocks"][:-1]:
        tok = run_block(tok, blk)
    attn = run_last_block(tok, params["blocks"][-1])   # (B, HEADS, N)

    # --- attentions[:, :, 0, 1:] -> (B, heads, w_featmap, h_featmap)
    cls_attn = attn[:, :, 1:].reshape(B, HEADS, w_featmap, h_featmap)
    if interpolate:
        # nearest-neighbour upsample, scale_factor=16
        cls_attn = jnp.repeat(jnp.repeat(cls_attn, PATCH, axis=-2), PATCH, axis=-1)
    return cls_attn


class IBotPallas:
    def __init__(self, key, img_size=(32, 32), interpolate=False):
        self.interpolate = interpolate
        num_patches = (img_size[0] // PATCH) * (img_size[1] // PATCH)
        self.params = init_params(key, num_patches)
        self._fwd = jax.jit(
            lambda prm, xx: ibot_forward(prm, xx, self.interpolate))

    def __call__(self, x):
        return self._fwd(self.params, x)


# ----------------------------- main -------------------------------------------
if __name__ == "__main__":
    B, C, H, W = 2, 3, 32, 32
    x = jax.random.normal(jax.random.PRNGKey(0), (B, C, H, W), jnp.float32)

    model = IBotPallas(key=jax.random.PRNGKey(1), img_size=(H, W), interpolate=False)
    attn_maps = jax.block_until_ready(model(x))

    assert attn_maps.shape == (B, HEADS, H // PATCH, W // PATCH), attn_maps.shape
    assert bool(jnp.all(jnp.isfinite(attn_maps)))
    assert bool(jnp.all(attn_maps >= 0.0)) and bool(jnp.all(attn_maps <= 1.0))
    print("KERNEL_OK")
</pallas_src>

<mosaic_0001>
module attributes {stable_mosaic.version = 11 : i64} {
  func.func @block_kernel(%arg0: i32, %arg1: memref<1x5x128xf32, #tpu.memory_space<vmem>>, %arg2: memref<128x384xbf16, #tpu.memory_space<vmem>>, %arg3: memref<128x128xbf16, #tpu.memory_space<vmem>>, %arg4: memref<128x256xbf16, #tpu.memory_space<vmem>>, %arg5: memref<256x128xbf16, #tpu.memory_space<vmem>>, %arg6: memref<8x384xf32, #tpu.memory_space<vmem>>, %arg7: memref<1x5x128xf32, #tpu.memory_space<vmem>>) attributes {dimension_semantics = [#tpu.dimension_semantics<parallel>], iteration_bounds = array<i64: 2>, scalar_prefetch = 0 : i64, scratch_operands = 0 : i64, tpu.core_type = #tpu.core_type<tc>, window_params = [{transform_indices = @transform_0, window_bounds = array<i64: 1, 5, 128>}, {pipeline_mode = #tpu.pipeline_mode<synchronous>, transform_indices = @transform_1, window_bounds = array<i64: 128, 384>}, {pipeline_mode = #tpu.pipeline_mode<synchronous>, transform_indices = @transform_2, window_bounds = array<i64: 128, 128>}, {pipeline_mode = #tpu.pipeline_mode<synchronous>, transform_indices = @transform_3, window_bounds = array<i64: 128, 256>}, {pipeline_mode = #tpu.pipeline_mode<synchronous>, transform_indices = @transform_4, window_bounds = array<i64: 256, 128>}, {pipeline_mode = #tpu.pipeline_mode<synchronous>, transform_indices = @transform_5, window_bounds = array<i64: 8, 384>}, {transform_indices = @transform_6, window_bounds = array<i64: 1, 5, 128>}]} {
    %c0 = arith.constant 0 : index
    %c0_0 = arith.constant 0 : index
    %c0_1 = arith.constant 0 : index
    %0 = vector.load %arg1[%c0, %c0_0, %c0_1] : memref<1x5x128xf32, #tpu.memory_space<vmem>>, vector<1x5x128xf32>
    %1 = vector.shape_cast %0 : vector<1x5x128xf32> to vector<5x128xf32>
    %c0_2 = arith.constant 0 : index
    %c0_3 = arith.constant 0 : index
    %2 = vector.load %arg6[%c0_2, %c0_3] : memref<8x384xf32, #tpu.memory_space<vmem>>, vector<8x384xf32>
    %3 = vector.extract_strided_slice %2 {offsets = [0, 0], sizes = [1, 128], strides = [1, 1]} : vector<8x384xf32> to vector<1x128xf32>
    %4 = vector.extract_strided_slice %2 {offsets = [1, 0], sizes = [1, 128], strides = [1, 1]} : vector<8x384xf32> to vector<1x128xf32>
    %5 = vector.extract_strided_slice %2 {offsets = [2, 0], sizes = [1, 384], strides = [1, 1]} : vector<8x384xf32> to vector<1x384xf32>
    %6 = vector.extract_strided_slice %2 {offsets = [3, 0], sizes = [1, 128], strides = [1, 1]} : vector<8x384xf32> to vector<1x128xf32>
    %7 = vector.extract_strided_slice %2 {offsets = [4, 0], sizes = [1, 128], strides = [1, 1]} : vector<8x384xf32> to vector<1x128xf32>
    %8 = vector.extract_strided_slice %2 {offsets = [5, 0], sizes = [1, 128], strides = [1, 1]} : vector<8x384xf32> to vector<1x128xf32>
    %9 = vector.extract_strided_slice %2 {offsets = [6, 0], sizes = [1, 256], strides = [1, 1]} : vector<8x384xf32> to vector<1x256xf32>
    %10 = vector.extract_strided_slice %2 {offsets = [7, 0], sizes = [1, 128], strides = [1, 1]} : vector<8x384xf32> to vector<1x128xf32>
    %cst = arith.constant dense<0.000000e+00> : vector<5xf32>
    %11 = vector.multi_reduction <add>, %1, %cst [1] : vector<5x128xf32> to vector<5xf32>
    %12 = vector.shape_cast %11 : vector<5xf32> to vector<5x1xf32>
    %cst_4 = arith.constant 1.280000e+02 : f32
    %13 = vector.broadcast %cst_4 : f32 to vector<5x1xf32>
    %14 = arith.divf %12, %13 : vector<5x1xf32>
    %15 = vector.broadcast %14 : vector<5x1xf32> to vector<5x128xf32>
    %16 = arith.subf %1, %15 : vector<5x128xf32>
    %17 = arith.mulf %16, %16 : vector<5x128xf32>
    %cst_5 = arith.constant dense<0.000000e+00> : vector<5xf32>
    %18 = vector.multi_reduction <add>, %17, %cst_5 [1] : vector<5x128xf32> to vector<5xf32>
    %19 = vector.shape_cast %18 : vector<5xf32> to vector<5x1xf32>
    %cst_6 = arith.constant 1.280000e+02 : f32
    %20 = vector.broadcast %cst_6 : f32 to vector<5x1xf32>
    %21 = arith.divf %19, %20 : vector<5x1xf32>
    %22 = vector.broadcast %14 : vector<5x1xf32> to vector<5x128xf32>
    %23 = arith.subf %1, %22 : vector<5x128xf32>
    %cst_7 = arith.constant 9.99999997E-7 : f32
    %24 = vector.broadcast %cst_7 : f32 to vector<5x1xf32>
    %25 = arith.addf %21, %24 : vector<5x1xf32>
    %26 = math.rsqrt %25 : vector<5x1xf32>
    %27 = vector.broadcast %26 : vector<5x1xf32> to vector<5x128xf32>
    %28 = arith.mulf %23, %27 : vector<5x128xf32>
    %29 = vector.broadcast %3 : vector<1x128xf32> to vector<5x128xf32>
    %30 = arith.mulf %28, %29 : vector<5x128xf32>
    %31 = vector.broadcast %4 : vector<1x128xf32> to vector<5x128xf32>
    %32 = arith.addf %30, %31 : vector<5x128xf32>
    %33 = arith.truncf %32 : vector<5x128xf32> to vector<5x128xbf16>
    %c0_8 = arith.constant 0 : index
    %c0_9 = arith.constant 0 : index
    %34 = vector.load %arg2[%c0_8, %c0_9] : memref<128x384xbf16, #tpu.memory_space<vmem>>, vector<128x384xbf16>
    %cst_10 = arith.constant dense<0.000000e+00> : vector<5x384xf32>
    %35 = tpu.matmul %33, %34, %cst_10 {dimension_numbers = #tpu.dot_dimension_numbers<[1], [0], [0], [1], [0, 0, 1, 1], [], []>} : vector<5x128xbf16>, vector<128x384xbf16>, vector<5x384xf32> -> vector<5x384xf32>
    %36 = vector.broadcast %5 : vector<1x384xf32> to vector<5x384xf32>
    %37 = arith.addf %35, %36 : vector<5x384xf32>
    %38 = vector.extract_strided_slice %37 {offsets = [0, 0], sizes = [5, 32], strides = [1, 1]} : vector<5x384xf32> to vector<5x32xf32>
    %39 = vector.extract_strided_slice %37 {offsets = [0, 128], sizes = [5, 32], strides = [1, 1]} : vector<5x384xf32> to vector<5x32xf32>
    %40 = vector.extract_strided_slice %37 {offsets = [0, 256], sizes = [5, 32], strides = [1, 1]} : vector<5x384xf32> to vector<5x32xf32>
    %cst_11 = arith.constant dense<0.000000e+00> : vector<5x5xf32>
    %41 = tpu.matmul %38, %39, %cst_11 {dimension_numbers = #tpu.dot_dimension_numbers<[1], [1], [0], [0], [0, 0, 1, 0], [], []>} : vector<5x32xf32>, vector<5x32xf32>, vector<5x5xf32> -> vector<5x5xf32>
    %cst_12 = arith.constant 0.176776692 : f32
    %42 = vector.broadcast %cst_12 : f32 to vector<5x5xf32>
    %43 = arith.mulf %41, %42 : vector<5x5xf32>
    %cst_13 = arith.constant dense<0xFF800000> : vector<5xf32>
    %44 = vector.multi_reduction <maximumf>, %43, %cst_13 [1] : vector<5x5xf32> to vector<5xf32>
    %45 = vector.shape_cast %44 : vector<5xf32> to vector<5x1xf32>
    %46 = vector.broadcast %45 : vector<5x1xf32> to vector<5x5xf32>
    %47 = arith.subf %43, %46 : vector<5x5xf32>
    %48 = math.exp %47 : vector<5x5xf32>
    %cst_14 = arith.constant dense<0.000000e+00> : vector<5xf32>
    %49 = vector.multi_reduction <add>, %48, %cst_14 [1] : vector<5x5xf32> to vector<5xf32>
    %50 = vector.shape_cast %49 : vector<5xf32> to vector<5x1xf32>
    %51 = tpu.reciprocal %50 {approx = true} : vector<5x1xf32> -> vector<5x1xf32>
    %52 = vector.broadcast %51 : vector<5x1xf32> to vector<5x5xf32>
    %53 = arith.mulf %48, %52 : vector<5x5xf32>
    %54 = arith.truncf %53 : vector<5x5xf32> to vector<5x5xbf16>
    %55 = arith.truncf %40 : vector<5x32xf32> to vector<5x32xbf16>
    %cst_15 = arith.constant dense<0.000000e+00> : vector<5x32xf32>
    %56 = tpu.matmul %54, %55, %cst_15 {dimension_numbers = #tpu.dot_dimension_numbers<[1], [0], [0], [1], [0, 0, 1, 1], [], []>} : vector<5x5xbf16>, vector<5x32xbf16>, vector<5x32xf32> -> vector<5x32xf32>
    %57 = vector.extract_strided_slice %37 {offsets = [0, 32], sizes = [5, 32], strides = [1, 1]} : vector<5x384xf32> to vector<5x32xf32>
    %58 = vector.extract_strided_slice %37 {offsets = [0, 160], sizes = [5, 32], strides = [1, 1]} : vector<5x384xf32> to vector<5x32xf32>
    %59 = vector.extract_strided_slice %37 {offsets = [0, 288], sizes = [5, 32], strides = [1, 1]} : vector<5x384xf32> to vector<5x32xf32>
    %cst_16 = arith.constant dense<0.000000e+00> : vector<5x5xf32>
    %60 = tpu.matmul %57, %58, %cst_16 {dimension_numbers = #tpu.dot_dimension_numbers<[1], [1], [0], [0], [0, 0, 1, 0], [], []>} : vector<5x32xf32>, vector<5x32xf32>, vector<5x5xf32> -> vector<5x5xf32>
    %cst_17 = arith.constant 0.176776692 : f32
    %61 = vector.broadcast %cst_17 : f32 to vector<5x5xf32>
    %62 = arith.mulf %60, %61 : vector<5x5xf32>
    %cst_18 = arith.constant dense<0xFF800000> : vector<5xf32>
    %63 = vector.multi_reduction <maximumf>, %62, %cst_18 [1] : vector<5x5xf32> to vector<5xf32>
    %64 = vector.shape_cast %63 : vector<5xf32> to vector<5x1xf32>
    %65 = vector.broadcast %64 : vector<5x1xf32> to vector<5x5xf32>
    %66 = arith.subf %62, %65 : vector<5x5xf32>
    %67 = math.exp %66 : vector<5x5xf32>
    %cst_19 = arith.constant dense<0.000000e+00> : vector<5xf32>
    %68 = vector.multi_reduction <add>, %67, %cst_19 [1] : vector<5x5xf32> to vector<5xf32>
    %69 = vector.shape_cast %68 : vector<5xf32> to vector<5x1xf32>
    %70 = tpu.reciprocal %69 {approx = true} : vector<5x1xf32> -> vector<5x1xf32>
    %71 = vector.broadcast %70 : vector<5x1xf32> to vector<5x5xf32>
    %72 = arith.mulf %67, %71 : vector<5x5xf32>
    %73 = arith.truncf %72 : vector<5x5xf32> to vector<5x5xbf16>
    %74 = arith.truncf %59 : vector<5x32xf32> to vector<5x32xbf16>
    %cst_20 = arith.constant dense<0.000000e+00> : vector<5x32xf32>
    %75 = tpu.matmul %73, %74, %cst_20 {dimension_numbers = #tpu.dot_dimension_numbers<[1], [0], [0], [1], [0, 0, 1, 1], [], []>} : vector<5x5xbf16>, vector<5x32xbf16>, vector<5x32xf32> -> vector<5x32xf32>
    %76 = vector.extract_strided_slice %37 {offsets = [0, 64], sizes = [5, 32], strides = [1, 1]} : vector<5x384xf32> to vector<5x32xf32>
    %77 = vector.extract_strided_slice %37 {offsets = [0, 192], sizes = [5, 32], strides = [1, 1]} : vector<5x384xf32> to vector<5x32xf32>
    %78 = vector.extract_strided_slice %37 {offsets = [0, 320], sizes = [5, 32], strides = [1, 1]} : vector<5x384xf32> to vector<5x32xf32>
    %cst_21 = arith.constant dense<0.000000e+00> : vector<5x5xf32>
    %79 = tpu.matmul %76, %77, %cst_21 {dimension_numbers = #tpu.dot_dimension_numbers<[1], [1], [0], [0], [0, 0, 1, 0], [], []>} : vector<5x32xf32>, vector<5x32xf32>, vector<5x5xf32> -> vector<5x5xf32>
    %cst_22 = arith.constant 0.176776692 : f32
    %80 = vector.broadcast %cst_22 : f32 to vector<5x5xf32>
    %81 = arith.mulf %79, %80 : vector<5x5xf32>
    %cst_23 = arith.constant dense<0xFF800000> : vector<5xf32>
    %82 = vector.multi_reduction <maximumf>, %81, %cst_23 [1] : vector<5x5xf32> to vector<5xf32>
    %83 = vector.shape_cast %82 : vector<5xf32> to vector<5x1xf32>
    %84 = vector.broadcast %83 : vector<5x1xf32> to vector<5x5xf32>
    %85 = arith.subf %81, %84 : vector<5x5xf32>
    %86 = math.exp %85 : vector<5x5xf32>
    %cst_24 = arith.constant dense<0.000000e+00> : vector<5xf32>
    %87 = vector.multi_reduction <add>, %86, %cst_24 [1] : vector<5x5xf32> to vector<5xf32>
    %88 = vector.shape_cast %87 : vector<5xf32> to vector<5x1xf32>
    %89 = tpu.reciprocal %88 {approx = true} : vector<5x1xf32> -> vector<5x1xf32>
    %90 = vector.broadcast %89 : vector<5x1xf32> to vector<5x5xf32>
    %91 = arith.mulf %86, %90 : vector<5x5xf32>
    %92 = arith.truncf %91 : vector<5x5xf32> to vector<5x5xbf16>
    %93 = arith.truncf %78 : vector<5x32xf32> to vector<5x32xbf16>
    %cst_25 = arith.constant dense<0.000000e+00> : vector<5x32xf32>
    %94 = tpu.matmul %92, %93, %cst_25 {dimension_numbers = #tpu.dot_dimension_numbers<[1], [0], [0], [1], [0, 0, 1, 1], [], []>} : vector<5x5xbf16>, vector<5x32xbf16>, vector<5x32xf32> -> vector<5x32xf32>
    %95 = vector.extract_strided_slice %37 {offsets = [0, 96], sizes = [5, 32], strides = [1, 1]} : vector<5x384xf32> to vector<5x32xf32>
    %96 = vector.extract_strided_slice %37 {offsets = [0, 224], sizes = [5, 32], strides = [1, 1]} : vector<5x384xf32> to vector<5x32xf32>
    %97 = vector.extract_strided_slice %37 {offsets = [0, 352], sizes = [5, 32], strides = [1, 1]} : vector<5x384xf32> to vector<5x32xf32>
    %cst_26 = arith.constant dense<0.000000e+00> : vector<5x5xf32>
    %98 = tpu.matmul %95, %96, %cst_26 {dimension_numbers = #tpu.dot_dimension_numbers<[1], [1], [0], [0], [0, 0, 1, 0], [], []>} : vector<5x32xf32>, vector<5x32xf32>, vector<5x5xf32> -> vector<5x5xf32>
    %cst_27 = arith.constant 0.176776692 : f32
    %99 = vector.broadcast %cst_27 : f32 to vector<5x5xf32>
    %100 = arith.mulf %98, %99 : vector<5x5xf32>
    %cst_28 = arith.constant dense<0xFF800000> : vector<5xf32>
    %101 = vector.multi_reduction <maximumf>, %100, %cst_28 [1] : vector<5x5xf32> to vector<5xf32>
    %102 = vector.shape_cast %101 : vector<5xf32> to vector<5x1xf32>
    %103 = vector.broadcast %102 : vector<5x1xf32> to vector<5x5xf32>
    %104 = arith.subf %100, %103 : vector<5x5xf32>
    %105 = math.exp %104 : vector<5x5xf32>
    %cst_29 = arith.constant dense<0.000000e+00> : vector<5xf32>
    %106 = vector.multi_reduction <add>, %105, %cst_29 [1] : vector<5x5xf32> to vector<5xf32>
    %107 = vector.shape_cast %106 : vector<5xf32> to vector<5x1xf32>
    %108 = tpu.reciprocal %107 {approx = true} : vector<5x1xf32> -> vector<5x1xf32>
    %109 = vector.broadcast %108 : vector<5x1xf32> to vector<5x5xf32>
    %110 = arith.mulf %105, %109 : vector<5x5xf32>
    %111 = arith.truncf %110 : vector<5x5xf32> to vector<5x5xbf16>
    %112 = arith.truncf %97 : vector<5x32xf32> to vector<5x32xbf16>
    %cst_30 = arith.constant dense<0.000000e+00> : vector<5x32xf32>
    %113 = tpu.matmul %111, %112, %cst_30 {dimension_numbers = #tpu.dot_dimension_numbers<[1], [0], [0], [1], [0, 0, 1, 1], [], []>} : vector<5x5xbf16>, vector<5x32xbf16>, vector<5x32xf32> -> vector<5x32xf32>
    %114 = tpu.concatenate %56, %75, %94, %113 in 1 : vector<5x32xf32>, vector<5x32xf32>, vector<5x32xf32>, vector<5x32xf32> -> vector<5x128xf32>
    %115 = arith.truncf %114 : vector<5x128xf32> to vector<5x128xbf16>
    %c0_31 = arith.constant 0 : index
    %c0_32 = arith.constant 0 : index
    %116 = vector.load %arg3[%c0_31, %c0_32] : memref<128x128xbf16, #tpu.memory_space<vmem>>, vector<128x128xbf16>
    %cst_33 = arith.constant dense<0.000000e+00> : vector<5x128xf32>
    %117 = tpu.matmul %115, %116, %cst_33 {dimension_numbers = #tpu.dot_dimension_numbers<[1], [0], [0], [1], [0, 0, 1, 1], [], []>} : vector<5x128xbf16>, vector<128x128xbf16>, vector<5x128xf32> -> vector<5x128xf32>
    %118 = vector.broadcast %6 : vector<1x128xf32> to vector<5x128xf32>
    %119 = arith.addf %117, %118 : vector<5x128xf32>
    %120 = arith.addf %1, %119 : vector<5x128xf32>
    %cst_34 = arith.constant dense<0.000000e+00> : vector<5xf32>
    %121 = vector.multi_reduction <add>, %120, %cst_34 [1] : vector<5x128xf32> to vector<5xf32>
    %122 = vector.shape_cast %121 : vector<5xf32> to vector<5x1xf32>
    %cst_35 = arith.constant 1.280000e+02 : f32
    %123 = vector.broadcast %cst_35 : f32 to vector<5x1xf32>
    %124 = arith.divf %122, %123 : vector<5x1xf32>
    %125 = vector.broadcast %124 : vector<5x1xf32> to vector<5x128xf32>
    %126 = arith.subf %120, %125 : vector<5x128xf32>
    %127 = arith.mulf %126, %126 : vector<5x128xf32>
    %cst_36 = arith.constant dense<0.000000e+00> : vector<5xf32>
    %128 = vector.multi_reduction <add>, %127, %cst_36 [1] : vector<5x128xf32> to vector<5xf32>
    %129 = vector.shape_cast %128 : vector<5xf32> to vector<5x1xf32>
    %cst_37 = arith.constant 1.280000e+02 : f32
    %130 = vector.broadcast %cst_37 : f32 to vector<5x1xf32>
    %131 = arith.divf %129, %130 : vector<5x1xf32>
    %132 = vector.broadcast %124 : vector<5x1xf32> to vector<5x128xf32>
    %133 = arith.subf %120, %132 : vector<5x128xf32>
    %cst_38 = arith.constant 9.99999997E-7 : f32
    %134 = vector.broadcast %cst_38 : f32 to vector<5x1xf32>
    %135 = arith.addf %131, %134 : vector<5x1xf32>
    %136 = math.rsqrt %135 : vector<5x1xf32>
    %137 = vector.broadcast %136 : vector<5x1xf32> to vector<5x128xf32>
    %138 = arith.mulf %133, %137 : vector<5x128xf32>
    %139 = vector.broadcast %7 : vector<1x128xf32> to vector<5x128xf32>
    %140 = arith.mulf %138, %139 : vector<5x128xf32>
    %141 = vector.broadcast %8 : vector<1x128xf32> to vector<5x128xf32>
    %142 = arith.addf %140, %141 : vector<5x128xf32>
    %143 = arith.truncf %142 : vector<5x128xf32> to vector<5x128xbf16>
    %c0_39 = arith.constant 0 : index
    %c0_40 = arith.constant 0 : index
    %144 = vector.load %arg4[%c0_39, %c0_40] : memref<128x256xbf16, #tpu.memory_space<vmem>>, vector<128x256xbf16>
    %cst_41 = arith.constant dense<0.000000e+00> : vector<5x256xf32>
    %145 = tpu.matmul %143, %144, %cst_41 {dimension_numbers = #tpu.dot_dimension_numbers<[1], [0], [0], [1], [0, 0, 1, 1], [], []>} : vector<5x128xbf16>, vector<128x256xbf16>, vector<5x256xf32> -> vector<5x256xf32>
    %146 = vector.broadcast %9 : vector<1x256xf32> to vector<5x256xf32>
    %147 = arith.addf %145, %146 : vector<5x256xf32>
    %148 = arith.mulf %147, %147 : vector<5x256xf32>
    %149 = arith.mulf %147, %148 : vector<5x256xf32>
    %cst_42 = arith.constant 4.471500e-02 : f32
    %150 = vector.broadcast %cst_42 : f32 to vector<5x256xf32>
    %151 = arith.mulf %150, %149 : vector<5x256xf32>
    %152 = arith.addf %147, %151 : vector<5x256xf32>
    %cst_43 = arith.constant 0.797884583 : f32
    %153 = vector.broadcast %cst_43 : f32 to vector<5x256xf32>
    %154 = arith.mulf %153, %152 : vector<5x256xf32>
    %155 = math.tanh %154 : vector<5x256xf32>
    %cst_44 = arith.constant 1.000000e+00 : f32
    %156 = vector.broadcast %cst_44 : f32 to vector<5x256xf32>
    %157 = arith.addf %156, %155 : vector<5x256xf32>
    %cst_45 = arith.constant 5.000000e-01 : f32
    %158 = vector.broadcast %cst_45 : f32 to vector<5x256xf32>
    %159 = arith.mulf %158, %157 : vector<5x256xf32>
    %160 = arith.mulf %147, %159 : vector<5x256xf32>
    %161 = arith.truncf %160 : vector<5x256xf32> to vector<5x256xbf16>
    %c0_46 = arith.constant 0 : index
    %c0_47 = arith.constant 0 : index
    %162 = vector.load %arg5[%c0_46, %c0_47] : memref<256x128xbf16, #tpu.memory_space<vmem>>, vector<256x128xbf16>
    %cst_48 = arith.constant dense<0.000000e+00> : vector<5x128xf32>
    %163 = tpu.matmul %161, %162, %cst_48 {dimension_numbers = #tpu.dot_dimension_numbers<[1], [0], [0], [1], [0, 0, 1, 1], [], []>} : vector<5x256xbf16>, vector<256x128xbf16>, vector<5x128xf32> -> vector<5x128xf32>
    %164 = vector.broadcast %10 : vector<1x128xf32> to vector<5x128xf32>
    %165 = arith.addf %163, %164 : vector<5x128xf32>
    %166 = arith.addf %120, %165 : vector<5x128xf32>
    %c0_49 = arith.constant 0 : index
    %c0_50 = arith.constant 0 : index
    %c0_51 = arith.constant 0 : index
    %167 = vector.load %arg7[%c0_49, %c0_50, %c0_51] : memref<1x5x128xf32, #tpu.memory_space<vmem>>, vector<1x5x128xf32>
    %168 = vector.shape_cast %167 : vector<1x5x128xf32> to vector<5x128xf32>
    %169 = vector.shape_cast %166 : vector<5x128xf32> to vector<1x5x128xf32>
    tpu.vector_store %arg7[%c0_49, %c0_50, %c0_51], %169 {strides = array<i32>} : memref<1x5x128xf32, #tpu.memory_space<vmem>>, vector<1x5x128xf32>,
    return
  }
  func.func @transform_0(%arg0: i32) -> (i32, i32, i32) {
    %c0_i32 = arith.constant 0 : i32
    %c0_i32_0 = arith.constant 0 : i32
    %c0_i32_1 = arith.constant 0 : i32
    return %arg0, %c0_i32, %c0_i32_0 : i32, i32, i32
  }
  func.func @transform_1(%arg0: i32) -> (i32, i32) {
    %c0_i32 = arith.constant 0 : i32
    %c0_i32_0 = arith.constant 0 : i32
    %c0_i32_1 = arith.constant 0 : i32
    return %c0_i32, %c0_i32_0 : i32, i32
  }
  func.func @transform_2(%arg0: i32) -> (i32, i32) {
    %c0_i32 = arith.constant 0 : i32
    %c0_i32_0 = arith.constant 0 : i32
    %c0_i32_1 = arith.constant 0 : i32
    return %c0_i32, %c0_i32_0 : i32, i32
  }
  func.func @transform_3(%arg0: i32) -> (i32, i32) {
    %c0_i32 = arith.constant 0 : i32
    %c0_i32_0 = arith.constant 0 : i32
    %c0_i32_1 = arith.constant 0 : i32
    return %c0_i32, %c0_i32_0 : i32, i32
  }
  func.func @transform_4(%arg0: i32) -> (i32, i32) {
    %c0_i32 = arith.constant 0 : i32
    %c0_i32_0 = arith.constant 0 : i32
    %c0_i32_1 = arith.constant 0 : i32
    return %c0_i32, %c0_i32_0 : i32, i32
  }
  func.func @transform_5(%arg0: i32) -> (i32, i32) {
    %c0_i32 = arith.constant 0 : i32
    %c0_i32_0 = arith.constant 0 : i32
    %c0_i32_1 = arith.constant 0 : i32
    return %c0_i32, %c0_i32_0 : i32, i32
  }
  func.func @transform_6(%arg0: i32) -> (i32, i32, i32) {
    %c0_i32 = arith.constant 0 : i32
    %c0_i32_0 = arith.constant 0 : i32
    %c0_i32_1 = arith.constant 0 : i32
    return %arg0, %c0_i32, %c0_i32_0 : i32, i32, i32
  }
}

module attributes {stable_mosaic.version = 11 : i64} {
  func.func @embed_kernel(%arg0: i32, %arg1: memref<1x4x768xbf16, #tpu.memory_space<vmem>>, %arg2: memref<768x128xbf16, #tpu.memory_space<vmem>>, %arg3: memref<1x128xf32, #tpu.memory_space<vmem>>, %arg4: memref<1x128xf32, #tpu.memory_space<vmem>>, %arg5: memref<5x128xf32, #tpu.memory_space<vmem>>, %arg6: memref<1x5x128xf32, #tpu.memory_space<vmem>>) attributes {dimension_semantics = [#tpu.dimension_semantics<parallel>], iteration_bounds = array<i64: 2>, scalar_prefetch = 0 : i64, scratch_operands = 0 : i64, tpu.core_type = #tpu.core_type<tc>, window_params = [{transform_indices = @transform_0, window_bounds = array<i64: 1, 4, 768>}, {pipeline_mode = #tpu.pipeline_mode<synchronous>, transform_indices = @transform_1, window_bounds = array<i64: 768, 128>}, {pipeline_mode = #tpu.pipeline_mode<synchronous>, transform_indices = @transform_2, window_bounds = array<i64: 1, 128>}, {pipeline_mode = #tpu.pipeline_mode<synchronous>, transform_indices = @transform_3, window_bounds = array<i64: 1, 128>}, {pipeline_mode = #tpu.pipeline_mode<synchronous>, transform_indices = @transform_4, window_bounds = array<i64: 5, 128>}, {transform_indices = @transform_5, window_bounds = array<i64: 1, 5, 128>}]} {
    %c0 = arith.constant 0 : index
    %c0_0 = arith.constant 0 : index
    %c0_1 = arith.constant 0 : index
    %0 = vector.load %arg1[%c0, %c0_0, %c0_1] : memref<1x4x768xbf16, #tpu.memory_space<vmem>>, vector<1x4x768xbf16>
    %1 = vector.shape_cast %0 : vector<1x4x768xbf16> to vector<4x768xbf16>
    %c0_2 = arith.constant 0 : index
    %c0_3 = arith.constant 0 : index
    %2 = vector.load %arg2[%c0_2, %c0_3] : memref<768x128xbf16, #tpu.memory_space<vmem>>, vector<768x128xbf16>
    %cst = arith.constant dense<0.000000e+00> : vector<4x128xf32>
    %3 = tpu.matmul %1, %2, %cst {dimension_numbers = #tpu.dot_dimension_numbers<[1], [0], [0], [1], [0, 0, 1, 1], [], []>} : vector<4x768xbf16>, vector<768x128xbf16>, vector<4x128xf32> -> vector<4x128xf32>
    %c0_4 = arith.constant 0 : index
    %c0_5 = arith.constant 0 : index
    %4 = vector.load %arg3[%c0_4, %c0_5] : memref<1x128xf32, #tpu.memory_space<vmem>>, vector<1x128xf32>
    %5 = vector.broadcast %4 : vector<1x128xf32> to vector<4x128xf32>
    %6 = arith.addf %3, %5 : vector<4x128xf32>
    %c0_6 = arith.constant 0 : index
    %c0_7 = arith.constant 0 : index
    %7 = vector.load %arg4[%c0_6, %c0_7] : memref<1x128xf32, #tpu.memory_space<vmem>>, vector<1x128xf32>
    %8 = tpu.concatenate %7, %6 in 0 : vector<1x128xf32>, vector<4x128xf32> -> vector<5x128xf32>
    %c0_8 = arith.constant 0 : index
    %c0_9 = arith.constant 0 : index
    %9 = vector.load %arg5[%c0_8, %c0_9] : memref<5x128xf32, #tpu.memory_space<vmem>>, vector<5x128xf32>
    %10 = arith.addf %8, %9 : vector<5x128xf32>
    %c0_10 = arith.constant 0 : index
    %c0_11 = arith.constant 0 : index
    %c0_12 = arith.constant 0 : index
    %11 = vector.load %arg6[%c0_10, %c0_11, %c0_12] : memref<1x5x128xf32, #tpu.memory_space<vmem>>, vector<1x5x128xf32>
    %12 = vector.shape_cast %11 : vector<1x5x128xf32> to vector<5x128xf32>
    %13 = vector.shape_cast %10 : vector<5x128xf32> to vector<1x5x128xf32>
    tpu.vector_store %arg6[%c0_10, %c0_11, %c0_12], %13 {strides = array<i32>} : memref<1x5x128xf32, #tpu.memory_space<vmem>>, vector<1x5x128xf32>,
    return
  }
  func.func @transform_0(%arg0: i32) -> (i32, i32, i32) {
    %c0_i32 = arith.constant 0 : i32
    %c0_i32_0 = arith.constant 0 : i32
    %c0_i32_1 = arith.constant 0 : i32
    return %arg0, %c0_i32, %c0_i32_0 : i32, i32, i32
  }
  func.func @transform_1(%arg0: i32) -> (i32, i32) {
    %c0_i32 = arith.constant 0 : i32
    %c0_i32_0 = arith.constant 0 : i32
    %c0_i32_1 = arith.constant 0 : i32
    return %c0_i32, %c0_i32_0 : i32, i32
  }
  func.func @transform_2(%arg0: i32) -> (i32, i32) {
    %c0_i32 = arith.constant 0 : i32
    %c0_i32_0 = arith.constant 0 : i32
    %c0_i32_1 = arith.constant 0 : i32
    return %c0_i32, %c0_i32_0 : i32, i32
  }
  func.func @transform_3(%arg0: i32) -> (i32, i32) {
    %c0_i32 = arith.constant 0 : i32
    %c0_i32_0 = arith.constant 0 : i32
    %c0_i32_1 = arith.constant 0 : i32
    return %c0_i32, %c0_i32_0 : i32, i32
  }
  func.func @transform_4(%arg0: i32) -> (i32, i32) {
    %c0_i32 = arith.constant 0 : i32
    %c0_i32_0 = arith.constant 0 : i32
    %c0_i32_1 = arith.constant 0 : i32
    return %c0_i32, %c0_i32_0 : i32, i32
  }
  func.func @transform_5(%arg0: i32) -> (i32, i32, i32) {
    %c0_i32 = arith.constant 0 : i32
    %c0_i32_0 = arith.constant 0 : i32
    %c0_i32_1 = arith.constant 0 : i32
    return %arg0, %c0_i32, %c0_i32_0 : i32, i32, i32
  }
}

module attributes {stable_mosaic.version = 11 : i64} {
  func.func @last_attn_kernel(%arg0: i32, %arg1: memref<1x5x128xf32, #tpu.memory_space<vmem>>, %arg2: memref<128x256xbf16, #tpu.memory_space<vmem>>, %arg3: memref<8x384xf32, #tpu.memory_space<vmem>>, %arg4: memref<1x4x5xf32, #tpu.memory_space<vmem>>) attributes {dimension_semantics = [#tpu.dimension_semantics<parallel>], iteration_bounds = array<i64: 2>, scalar_prefetch = 0 : i64, scratch_operands = 0 : i64, tpu.core_type = #tpu.core_type<tc>, window_params = [{transform_indices = @transform_0, window_bounds = array<i64: 1, 5, 128>}, {pipeline_mode = #tpu.pipeline_mode<synchronous>, transform_indices = @transform_1, window_bounds = array<i64: 128, 256>}, {pipeline_mode = #tpu.pipeline_mode<synchronous>, transform_indices = @transform_2, window_bounds = array<i64: 8, 384>}, {transform_indices = @transform_3, window_bounds = array<i64: 1, 4, 5>}]} {
    %c0 = arith.constant 0 : index
    %c0_0 = arith.constant 0 : index
    %c0_1 = arith.constant 0 : index
    %0 = vector.load %arg1[%c0, %c0_0, %c0_1] : memref<1x5x128xf32, #tpu.memory_space<vmem>>, vector<1x5x128xf32>
    %1 = vector.shape_cast %0 : vector<1x5x128xf32> to vector<5x128xf32>
    %c0_2 = arith.constant 0 : index
    %c0_3 = arith.constant 0 : index
    %2 = vector.load %arg3[%c0_2, %c0_3] : memref<8x384xf32, #tpu.memory_space<vmem>>, vector<8x384xf32>
    %3 = vector.extract_strided_slice %2 {offsets = [0, 0], sizes = [1, 128], strides = [1, 1]} : vector<8x384xf32> to vector<1x128xf32>
    %4 = vector.extract_strided_slice %2 {offsets = [1, 0], sizes = [1, 128], strides = [1, 1]} : vector<8x384xf32> to vector<1x128xf32>
    %5 = vector.extract_strided_slice %2 {offsets = [2, 0], sizes = [1, 256], strides = [1, 1]} : vector<8x384xf32> to vector<1x256xf32>
    %cst = arith.constant dense<0.000000e+00> : vector<5xf32>
    %6 = vector.multi_reduction <add>, %1, %cst [1] : vector<5x128xf32> to vector<5xf32>
    %7 = vector.shape_cast %6 : vector<5xf32> to vector<5x1xf32>
    %cst_4 = arith.constant 1.280000e+02 : f32
    %8 = vector.broadcast %cst_4 : f32 to vector<5x1xf32>
    %9 = arith.divf %7, %8 : vector<5x1xf32>
    %10 = vector.broadcast %9 : vector<5x1xf32> to vector<5x128xf32>
    %11 = arith.subf %1, %10 : vector<5x128xf32>
    %12 = arith.mulf %11, %11 : vector<5x128xf32>
    %cst_5 = arith.constant dense<0.000000e+00> : vector<5xf32>
    %13 = vector.multi_reduction <add>, %12, %cst_5 [1] : vector<5x128xf32> to vector<5xf32>
    %14 = vector.shape_cast %13 : vector<5xf32> to vector<5x1xf32>
    %cst_6 = arith.constant 1.280000e+02 : f32
    %15 = vector.broadcast %cst_6 : f32 to vector<5x1xf32>
    %16 = arith.divf %14, %15 : vector<5x1xf32>
    %17 = vector.broadcast %9 : vector<5x1xf32> to vector<5x128xf32>
    %18 = arith.subf %1, %17 : vector<5x128xf32>
    %cst_7 = arith.constant 9.99999997E-7 : f32
    %19 = vector.broadcast %cst_7 : f32 to vector<5x1xf32>
    %20 = arith.addf %16, %19 : vector<5x1xf32>
    %21 = math.rsqrt %20 : vector<5x1xf32>
    %22 = vector.broadcast %21 : vector<5x1xf32> to vector<5x128xf32>
    %23 = arith.mulf %18, %22 : vector<5x128xf32>
    %24 = vector.broadcast %3 : vector<1x128xf32> to vector<5x128xf32>
    %25 = arith.mulf %23, %24 : vector<5x128xf32>
    %26 = vector.broadcast %4 : vector<1x128xf32> to vector<5x128xf32>
    %27 = arith.addf %25, %26 : vector<5x128xf32>
    %28 = arith.truncf %27 : vector<5x128xf32> to vector<5x128xbf16>
    %c0_8 = arith.constant 0 : index
    %c0_9 = arith.constant 0 : index
    %29 = vector.load %arg2[%c0_8, %c0_9] : memref<128x256xbf16, #tpu.memory_space<vmem>>, vector<128x256xbf16>
    %cst_10 = arith.constant dense<0.000000e+00> : vector<5x256xf32>
    %30 = tpu.matmul %28, %29, %cst_10 {dimension_numbers = #tpu.dot_dimension_numbers<[1], [0], [0], [1], [0, 0, 1, 1], [], []>} : vector<5x128xbf16>, vector<128x256xbf16>, vector<5x256xf32> -> vector<5x256xf32>
    %31 = vector.broadcast %5 : vector<1x256xf32> to vector<5x256xf32>
    %32 = arith.addf %30, %31 : vector<5x256xf32>
    %33 = vector.extract_strided_slice %32 {offsets = [0, 0], sizes = [1, 32], strides = [1, 1]} : vector<5x256xf32> to vector<1x32xf32>
    %34 = vector.extract_strided_slice %32 {offsets = [0, 128], sizes = [5, 32], strides = [1, 1]} : vector<5x256xf32> to vector<5x32xf32>
    %cst_11 = arith.constant dense<0.000000e+00> : vector<1x5xf32>
    %35 = tpu.matmul %33, %34, %cst_11 {dimension_numbers = #tpu.dot_dimension_numbers<[1], [1], [0], [0], [0, 0, 1, 0], [], []>} : vector<1x32xf32>, vector<5x32xf32>, vector<1x5xf32> -> vector<1x5xf32>
    %cst_12 = arith.constant 0.176776692 : f32
    %36 = vector.broadcast %cst_12 : f32 to vector<1x5xf32>
    %37 = arith.mulf %35, %36 : vector<1x5xf32>
    %cst_13 = arith.constant dense<0xFF800000> : vector<1xf32>
    %38 = vector.multi_reduction <maximumf>, %37, %cst_13 [1] : vector<1x5xf32> to vector<1xf32>
    %39 = vector.shape_cast %38 : vector<1xf32> to vector<1x1xf32>
    %40 = vector.broadcast %39 : vector<1x1xf32> to vector<1x5xf32>
    %41 = arith.subf %37, %40 : vector<1x5xf32>
    %42 = math.exp %41 : vector<1x5xf32>
    %cst_14 = arith.constant dense<0.000000e+00> : vector<1xf32>
    %43 = vector.multi_reduction <add>, %42, %cst_14 [1] : vector<1x5xf32> to vector<1xf32>
    %44 = vector.shape_cast %43 : vector<1xf32> to vector<1x1xf32>
    %45 = tpu.reciprocal %44 {approx = true} : vector<1x1xf32> -> vector<1x1xf32>
    %46 = vector.broadcast %45 : vector<1x1xf32> to vector<1x5xf32>
    %47 = arith.mulf %42, %46 : vector<1x5xf32>
    %48 = vector.extract_strided_slice %32 {offsets = [0, 32], sizes = [1, 32], strides = [1, 1]} : vector<5x256xf32> to vector<1x32xf32>
    %49 = vector.extract_strided_slice %32 {offsets = [0, 160], sizes = [5, 32], strides = [1, 1]} : vector<5x256xf32> to vector<5x32xf32>
    %cst_15 = arith.constant dense<0.000000e+00> : vector<1x5xf32>
    %50 = tpu.matmul %48, %49, %cst_15 {dimension_numbers = #tpu.dot_dimension_numbers<[1], [1], [0], [0], [0, 0, 1, 0], [], []>} : vector<1x32xf32>, vector<5x32xf32>, vector<1x5xf32> -> vector<1x5xf32>
    %cst_16 = arith.constant 0.176776692 : f32
    %51 = vector.broadcast %cst_16 : f32 to vector<1x5xf32>
    %52 = arith.mulf %50, %51 : vector<1x5xf32>
    %cst_17 = arith.constant dense<0xFF800000> : vector<1xf32>
    %53 = vector.multi_reduction <maximumf>, %52, %cst_17 [1] : vector<1x5xf32> to vector<1xf32>
    %54 = vector.shape_cast %53 : vector<1xf32> to vector<1x1xf32>
    %55 = vector.broadcast %54 : vector<1x1xf32> to vector<1x5xf32>
    %56 = arith.subf %52, %55 : vector<1x5xf32>
    %57 = math.exp %56 : vector<1x5xf32>
    %cst_18 = arith.constant dense<0.000000e+00> : vector<1xf32>
    %58 = vector.multi_reduction <add>, %57, %cst_18 [1] : vector<1x5xf32> to vector<1xf32>
    %59 = vector.shape_cast %58 : vector<1xf32> to vector<1x1xf32>
    %60 = tpu.reciprocal %59 {approx = true} : vector<1x1xf32> -> vector<1x1xf32>
    %61 = vector.broadcast %60 : vector<1x1xf32> to vector<1x5xf32>
    %62 = arith.mulf %57, %61 : vector<1x5xf32>
    %63 = vector.extract_strided_slice %32 {offsets = [0, 64], sizes = [1, 32], strides = [1, 1]} : vector<5x256xf32> to vector<1x32xf32>
    %64 = vector.extract_strided_slice %32 {offsets = [0, 192], sizes = [5, 32], strides = [1, 1]} : vector<5x256xf32> to vector<5x32xf32>
    %cst_19 = arith.constant dense<0.000000e+00> : vector<1x5xf32>
    %65 = tpu.matmul %63, %64, %cst_19 {dimension_numbers = #tpu.dot_dimension_numbers<[1], [1], [0], [0], [0, 0, 1, 0], [], []>} : vector<1x32xf32>, vector<5x32xf32>, vector<1x5xf32> -> vector<1x5xf32>
    %cst_20 = arith.constant 0.176776692 : f32
    %66 = vector.broadcast %cst_20 : f32 to vector<1x5xf32>
    %67 = arith.mulf %65, %66 : vector<1x5xf32>
    %cst_21 = arith.constant dense<0xFF800000> : vector<1xf32>
    %68 = vector.multi_reduction <maximumf>, %67, %cst_21 [1] : vector<1x5xf32> to vector<1xf32>
    %69 = vector.shape_cast %68 : vector<1xf32> to vector<1x1xf32>
    %70 = vector.broadcast %69 : vector<1x1xf32> to vector<1x5xf32>
    %71 = arith.subf %67, %70 : vector<1x5xf32>
    %72 = math.exp %71 : vector<1x5xf32>
    %cst_22 = arith.constant dense<0.000000e+00> : vector<1xf32>
    %73 = vector.multi_reduction <add>, %72, %cst_22 [1] : vector<1x5xf32> to vector<1xf32>
    %74 = vector.shape_cast %73 : vector<1xf32> to vector<1x1xf32>
    %75 = tpu.reciprocal %74 {approx = true} : vector<1x1xf32> -> vector<1x1xf32>
    %76 = vector.broadcast %75 : vector<1x1xf32> to vector<1x5xf32>
    %77 = arith.mulf %72, %76 : vector<1x5xf32>
    %78 = vector.extract_strided_slice %32 {offsets = [0, 96], sizes = [1, 32], strides = [1, 1]} : vector<5x256xf32> to vector<1x32xf32>
    %79 = vector.extract_strided_slice %32 {offsets = [0, 224], sizes = [5, 32], strides = [1, 1]} : vector<5x256xf32> to vector<5x32xf32>
    %cst_23 = arith.constant dense<0.000000e+00> : vector<1x5xf32>
    %80 = tpu.matmul %78, %79, %cst_23 {dimension_numbers = #tpu.dot_dimension_numbers<[1], [1], [0], [0], [0, 0, 1, 0], [], []>} : vector<1x32xf32>, vector<5x32xf32>, vector<1x5xf32> -> vector<1x5xf32>
    %cst_24 = arith.constant 0.176776692 : f32
    %81 = vector.broadcast %cst_24 : f32 to vector<1x5xf32>
    %82 = arith.mulf %80, %81 : vector<1x5xf32>
    %cst_25 = arith.constant dense<0xFF800000> : vector<1xf32>
    %83 = vector.multi_reduction <maximumf>, %82, %cst_25 [1] : vector<1x5xf32> to vector<1xf32>
    %84 = vector.shape_cast %83 : vector<1xf32> to vector<1x1xf32>
    %85 = vector.broadcast %84 : vector<1x1xf32> to vector<1x5xf32>
    %86 = arith.subf %82, %85 : vector<1x5xf32>
    %87 = math.exp %86 : vector<1x5xf32>
    %cst_26 = arith.constant dense<0.000000e+00> : vector<1xf32>
    %88 = vector.multi_reduction <add>, %87, %cst_26 [1] : vector<1x5xf32> to vector<1xf32>
    %89 = vector.shape_cast %88 : vector<1xf32> to vector<1x1xf32>
    %90 = tpu.reciprocal %89 {approx = true} : vector<1x1xf32> -> vector<1x1xf32>
    %91 = vector.broadcast %90 : vector<1x1xf32> to vector<1x5xf32>
    %92 = arith.mulf %87, %91 : vector<1x5xf32>
    %93 = tpu.concatenate %47, %62, %77, %92 in 0 : vector<1x5xf32>, vector<1x5xf32>, vector<1x5xf32>, vector<1x5xf32> -> vector<4x5xf32>
    %c0_27 = arith.constant 0 : index
    %c0_28 = arith.constant 0 : index
    %c0_29 = arith.constant 0 : index
    %94 = vector.load %arg4[%c0_27, %c0_28, %c0_29] : memref<1x4x5xf32, #tpu.memory_space<vmem>>, vector<1x4x5xf32>
    %95 = vector.shape_cast %94 : vector<1x4x5xf32> to vector<4x5xf32>
    %96 = vector.shape_cast %93 : vector<4x5xf32> to vector<1x4x5xf32>
    tpu.vector_store %arg4[%c0_27, %c0_28, %c0_29], %96 {strides = array<i32>} : memref<1x4x5xf32, #tpu.memory_space<vmem>>, vector<1x4x5xf32>,
    return
  }
  func.func @transform_0(%arg0: i32) -> (i32, i32, i32) {
    %c0_i32 = arith.constant 0 : i32
    %c0_i32_0 = arith.constant 0 : i32
    %c0_i32_1 = arith.constant 0 : i32
    return %arg0, %c0_i32, %c0_i32_0 : i32, i32, i32
  }
  func.func @transform_1(%arg0: i32) -> (i32, i32) {
    %c0_i32 = arith.constant 0 : i32
    %c0_i32_0 = arith.constant 0 : i32
    %c0_i32_1 = arith.constant 0 : i32
    return %c0_i32, %c0_i32_0 : i32, i32
  }
  func.func @transform_2(%arg0: i32) -> (i32, i32) {
    %c0_i32 = arith.constant 0 : i32
    %c0_i32_0 = arith.constant 0 : i32
    %c0_i32_1 = arith.constant 0 : i32
    return %c0_i32, %c0_i32_0 : i32, i32
  }
  func.func @transform_3(%arg0: i32) -> (i32, i32, i32) {
    %c0_i32 = arith.constant 0 : i32
    %c0_i32_0 = arith.constant 0 : i32
    %c0_i32_1 = arith.constant 0 : i32
    return %arg0, %c0_i32, %c0_i32_0 : i32, i32, i32
  }
}

</mosaic_0001>

<bundles_post_ra>
// kernel: _lambda_.3
= control target key start
LH: loop header
LB: loop body
LE: loop exit
PB: predicated region body
PF: predicated region fallthrough
CT: control target
= control target key end

     0   :  { %s1055_s18 = smov 0   ;;  %s1237_s0 = inlined_call_operand.vmem [shape: bf16[2,4,768], index: 0, kind: input, shape index: {}]   ;;  %s1238_s1 = inlined_call_operand.vmem [shape: bf16[768,128], index: 1, kind: input, shape index: {}]   ;;  %s1239_s2 = inlined_call_operand.vmem [shape: f32[1,128], index: 2, kind: input, shape index: {}]   ;;  %s1240_s3 = inlined_call_operand.vmem [shape: f32[1,128], index: 3, kind: input, shape index: {}]   ;;  %s1241_s4 = inlined_call_operand.vmem [shape: f32[5,128], index: 4, kind: input, shape index: {}]   ;;  %s1242_s5 = inlined_call_operand.vmem [shape: f32[2,5,128], index: 5, kind: output, shape index: {}]  }
   0x1 LB: > { %s832_s19 = sadd.s32 4294967295, %s1022_s18   ;;  %p836_p0 = scmp.ge.s32.totalorder %s1022_s18, 1  ;;  %s1022_s18 = sphi %s1055_s18, %s15_s18  }
   0x2   : > { %p187_p1 = scmp.lt.s32.totalorder %s1022_s18, 3 }
   0x4   : > { %p188_p2 = pnand %p836_p0, %p187_p1 }
   0x5   : > { %v967_v0 = vld [vmem:[%s1238_s1 + $0x40] sm:$0xff] (!%p188_p2)   ;;  %v971_v4 = vld [vmem:[%s1238_s1 + $0x48] sm:$0xff] (!%p188_p2)   ;;  %v975_v8 = vld [vmem:[%s1238_s1 + $0x50] sm:$0xff] (!%p188_p2)   ;;  %p214_p3 = scmp.lt.s32.totalorder (!%p188_p2), %s832_s19, 1  ;;  %v335_v27 = vlaneseq (!%p188_p2)  ;;  %v1024_v35 = vmov (!%p188_p2), 1983009808  }
   0x6   : > { %191 = sbr.rel (%p188_p2) target bundleno = 293 (0x125), region = 40  ;;  %v968_v1 = vld [vmem:[%s1238_s1] sm:$0xff] (!%p188_p2)   ;;  %891 = vmatprep.subr.bf16.mxu0 (!%p188_p2), %v967_v0  ;;  %v972_v5 = vld [vmem:[%s1238_s1 + $0x8] sm:$0xff] (!%p188_p2)   ;;  %v976_v9 = vld [vmem:[%s1238_s1 + $0x10] sm:$0xff] (!%p188_p2)   ;;  %v333_v36 = vunpack.c.l.s4 (!%p188_p2), %v1024_v35  ;;  %vm774_vm0 = vcmask (!%p188_p2), 1040384  }
   0x7   : > { %v969_v2 = vld [vmem:[%s1238_s1 + $0xc0] sm:$0xff] (!%p188_p2)   ;;  %892 = vmatpush3.bf16.msra.mxu0 (!%p188_p2), %v968_v1  ;;  %v973_v6 = vld [vmem:[%s1238_s1 + $0xc8] sm:$0xff] (!%p188_p2)   ;;  %v977_v10 = vld [vmem:[%s1238_s1 + $0xd0] sm:$0xff] (!%p188_p2)   ;;  %v336_v32 = vshrl.u32 (!%p188_p2), %v335_v27, 7 }
   0x8   : > { %v970_v3 = vld [vmem:[%s1238_s1 + $0x80] sm:$0xff] (!%p188_p2)   ;;  %913 = vmatprep.subr.bf16.mxu1 (!%p188_p2), %v969_v2  ;;  %893 = vmatprep.subr.bf16.mxu0 (!%p188_p2), %v971_v4  ;;  %v974_v7 = vld [vmem:[%s1238_s1 + $0x88] sm:$0xff] (!%p188_p2)   ;;  %v978_v11 = vld [vmem:[%s1238_s1 + $0x90] sm:$0xff] (!%p188_p2)   ;;  %v334_v38 = vunpack.c.0.s8 (!%p188_p2), %v333_v36 }
   0x9   : > { %914 = vmatpush3.bf16.msra.mxu1 (!%p188_p2), %v970_v3  ;;  %v979_v12 = vld [vmem:[%s1238_s1 + $0x58] sm:$0xff] (!%p188_p2)   ;;  %v983_v16 = vld [vmem:[%s1238_s1 + $0x60] sm:$0xff] (!%p188_p2)   ;;  %v987_v20 = vld [vmem:[%s1238_s1 + $0x68] sm:$0xff] (!%p188_p2)  }
   0xa   : > { %915 = vmatprep.subr.bf16.mxu1 (!%p188_p2), %v973_v6  ;;  %v980_v13 = vld [vmem:[%s1238_s1 + $0x18] sm:$0xff] (!%p188_p2)   ;;  %v984_v17 = vld [vmem:[%s1238_s1 + $0x20] sm:$0xff] (!%p188_p2)   ;;  %v988_v21 = vld [vmem:[%s1238_s1 + $0x28] sm:$0xff] (!%p188_p2)   ;;  %v337_v40 = vsub.s32 (!%p188_p2), %v334_v38, %v336_v32 }
   0xb   : > { %894 = vmatpush3.bf16.msra.mxu0 (!%p188_p2), %v972_v5  ;;  %v981_v14 = vld [vmem:[%s1238_s1 + $0xd8] sm:$0xff] (!%p188_p2)   ;;  %v985_v18 = vld [vmem:[%s1238_s1 + $0xe0] sm:$0xff] (!%p188_p2)   ;;  %v989_v22 = vld [vmem:[%s1238_s1 + $0xe8] sm:$0xff] (!%p188_p2)  }
   0xc   : > { %895 = vmatprep.subr.bf16.mxu0 (!%p188_p2), %v975_v8  ;;  %v982_v15 = vld [vmem:[%s1238_s1 + $0x98] sm:$0xff] (!%p188_p2)   ;;  %v986_v19 = vld [vmem:[%s1238_s1 + $0xa0] sm:$0xff] (!%p188_p2)   ;;  %v990_v23 = vld [vmem:[%s1238_s1 + $0xa8] sm:$0xff] (!%p188_p2)  }
   0xd   : > { %916 = vmatpush3.bf16.msra.mxu1 %v974_v7  ;;  %s1244_s19 = smov (!%p214_p3, %s832_s19), 1  ;;  %v991_v24 = vld [vmem:[%s1238_s1 + $0x70] sm:$0xff]   ;;  %v995_v29 = vld [vmem:[%s1238_s1 + $0x78] sm:$0xff]   ;;  %v999_v37 = vld [vmem:[%s1238_s1 + $0x140] sm:$0xff]  }
   0xe   : > { %917 = vmatprep.subr.bf16.mxu1 %v977_v10  ;;  %s957_s24 = smul.u32 12, %s1244_s19  ;;  %v992_v25 = vld [vmem:[%s1238_s1 + $0x30] sm:$0xff]   ;;  %v996_v30 = vld [vmem:[%s1238_s1 + $0x38] sm:$0xff]   ;;  %v1001_v45 = vld [vmem:[%s1238_s1 + $0x100] sm:$0xff]   ;;  %s838_s30 = sshll.u32 %s1244_s19, 3 }
   0xf   : > { %896 = vmatpush3.bf16.msra.mxu0 %v976_v9  ;;  %v993_v26 = vld [vmem:[%s1238_s1 + $0xf0] sm:$0xff]   ;;  %v997_v31 = vld [vmem:[%s1238_s1 + $0xf8] sm:$0xff]   ;;  %v1002_v46 = vld [vmem:[%s1238_s1 + $0x148] sm:$0xff]   ;;  %s222_s13 = scalar_lea.vmem %s1242_s5, %s838_s30 }
  0x10   : > { %897 = vmatprep.subr.bf16.mxu0 %v979_v12  ;;  %v994_v28 = vld [vmem:[%s1238_s1 + $0xb0] sm:$0xff]   ;;  %s1160_s10 = scalar_lea.vmem %s1237_s0, %s957_s24  ;;  %v998_v34 = vld [vmem:[%s1238_s1 + $0xb8] sm:$0xff]   ;;  %v1003_v47 = vld [vmem:[%s1238_s1 + $0x108] sm:$0xff]  }
  0x11   : > { %918 = vmatpush3.bf16.msra.mxu1 %v978_v11  ;;  %v224_v33 = vld [vmem:[%s1160_s10] sm:$0xff]  ;;  %v1004_v48 = vld [vmem:[%s1238_s1 + $0x150] sm:$0xff]   ;;  %v840_v50 = vld.sshfl [vmem:[%s1160_s10 + $0x8] sm:$0x33 pattern:$0x76325410] }
  0x12   : > { %919 = vmatprep.subr.bf16.mxu1 %v981_v14  ;;  %v331_v39 = vcombine.high %v224_v33, %v224_v33  ;;  %v338_v41 = vrot.slane %v224_v33, %v337_v40  ;;  %v1005_v49 = vld [vmem:[%s1238_s1 + $0x110] sm:$0xff]   ;;  %v1006_v51 = vld [vmem:[%s1238_s1 + $0x158] sm:$0xff]   ;;  %v355_v52 = vcombine.high %v840_v50, %v840_v50  ;;  %v1008_v54 = vld [vmem:[%s1238_s1 + $0x160] sm:$0xff]  }
  0x13   : > { %898 = vmatpush3.bf16.msra.mxu0 %v980_v13  ;;  %v1007_v53 = vld [vmem:[%s1238_s1 + $0x118] sm:$0xff]   ;;  %v1009_v55 = vld [vmem:[%s1238_s1 + $0x120] sm:$0xff]   ;;  %v1010_v56 = vld [vmem:[%s1238_s1 + $0x168] sm:$0xff]  }
  0x14   : > { %899 = vmatprep.subr.bf16.mxu0 %v983_v16  ;;  %v345_v42 = vrot.slane %v331_v39, %v337_v40  ;;  %v346_v43 = vcombine.high %v338_v41, %v338_v41  ;;  %v1011_v57 = vld [vmem:[%s1238_s1 + $0x128] sm:$0xff]   ;;  %v1012_v58 = vld [vmem:[%s1238_s1 + $0x170] sm:$0xff]   ;;  %v1014_v60 = vld [vmem:[%s1238_s1 + $0x178] sm:$0xff]  }
  0x15   : > { %920 = vmatpush3.bf16.msra.mxu1 %v982_v15  ;;  %v1013_v59 = vld [vmem:[%s1238_s1 + $0x130] sm:$0xff]   ;;  %v1015_v61 = vld [vmem:[%s1238_s1 + $0x138] sm:$0xff]   ;;  %v839_v0 = vld [vmem:[%s1239_s2] ss:$0 sm:$0xff] }
  0x16   : > { %921 = vmatprep.subr.bf16.mxu1 %v985_v18  ;;  %v347_v44 = vcombine.high %v345_v42, %v345_v42  ;;  %682 = vmatprep.mubr.bf16.mxu0 %v346_v43 }
  0x17   : > { %900 = vmatpush3.bf16.msra.mxu0 %v984_v17  ;;  %v770_v17 = vld [vmem:[%s1240_s3] sm:$0x1] }
  0x18   : > { %901 = vmatprep.subr.bf16.mxu0 %v987_v20  ;;  %722 = vmatprep.mubr.bf16.mxu1 %v347_v44 }
  0x19   : > { %922 = vmatpush3.bf16.msra.mxu1 %v986_v19  ;;  %v776_v19 = vld [vmem:[%s1241_s4] sm:$0x1f] }
  0x1a   : > { %923 = vmatprep.subr.bf16.mxu1 %v989_v22 }
  0x1b   : > { %902 = vmatpush3.bf16.msra.mxu0 %v988_v21 }
  0x1c   : > { %903 = vmatprep.subr.bf16.mxu0 %v991_v24 }
  0x1d   : > { %924 = vmatpush3.bf16.msra.mxu1 %v990_v23 }
  0x1e   : > { %925 = vmatprep.subr.bf16.mxu1 %v993_v26 }
  0x1f   : > { %904 = vmatpush3.bf16.msra.mxu0 %v992_v25 }
  0x20   : > { %905 = vmatprep.subr.bf16.mxu0 %v995_v29 }
  0x21   : > { %926 = vmatpush3.bf16.msra.mxu1 %v994_v28 }
  0x22   : > { %927 = vmatprep.subr.bf16.mxu1 %v997_v31 }
  0x23   : > { %906 = vmatpush3.bf16.msra.mxu0 %v996_v30 }
  0x24   : > { %935 = vmatprep.subr.bf16.mxu0 %v999_v37 }
  0x25   : > { %928 = vmatpush3.bf16.msra.mxu1 %v998_v34 }
  0x26   : > { %683 = vmatmul.mubr.bf16.vlgmr.msra.gmra.mrb[0].mxu0 %v338_v41 }
  0x27   : > { %936 = vmatpush3.bf16.msra.mxu0 %v1001_v45  ;;  %762 = vmatprep.mubr.bf16.mxu0 %v355_v52 }
  0x28   : > { %723 = vmatmul.mubr.bf16.vlgmr.msra.gmra.mrb[0].mxu1 %v345_v42  ;;  %937 = vmatprep.subr.bf16.mxu0 %v1002_v46 }
  0x2b   : > { %938 = vmatpush3.bf16.msra.mxu0 %v1003_v47 }
  0x2c   : > { %939 = vmatprep.subr.bf16.mxu0 %v1004_v48 }
  0x2f   : > { %940 = vmatpush3.bf16.msra.mxu0 %v1005_v49 }
  0x30   : > { %941 = vmatprep.subr.bf16.mxu0 %v1006_v51 }
  0x33   : > { %942 = vmatpush3.bf16.msra.mxu0 %v1007_v53 }
  0x34   : > { %943 = vmatprep.subr.bf16.mxu0 %v1008_v54 }
  0x37   : > { %944 = vmatpush3.bf16.msra.mxu0 %v1009_v55 }
  0x38   : > { %945 = vmatprep.subr.bf16.mxu0 %v1010_v56 }
  0x3b   : > { %946 = vmatpush3.bf16.msra.mxu0 %v1011_v57 }
  0x3c   : > { %947 = vmatprep.subr.bf16.mxu0 %v1012_v58 }
  0x3f   : > { %948 = vmatpush3.bf16.msra.mxu0 %v1013_v59 }
  0x40   : > { %949 = vmatprep.subr.bf16.mxu0 %v1014_v60 }
  0x43   : > { %950 = vmatpush3.bf16.msra.mxu0 %v1015_v61 }
  0x46   : > { %763 = vmatmul.mubr.bf16.vlgmr.msra.gmra.mrb[4].mxu0 %v840_v50 }
  0xf9   : > { %v907_v62 = vpop.f32.mrb[0].mxu0 }
  0xfa   : > { %v908_v1 = vpop.f32.mrb[1].mxu0 }
  0xfb   : > { %v929_v63 = vpop.f32.mrb[0].mxu1  ;;  %v909_v3 = vadd.f32 %v908_v1, %v907_v62  ;;  %v910_v4 = vpop.f32.mrb[2].mxu0 }
  0xfc   : > { %v930_v2 = vpop.f32.mrb[1].mxu1  ;;  %v911_v7 = vpop.f32.mrb[3].mxu0 }
  0xfd   : > { %v931_v5 = vadd.f32 %v930_v2, %v929_v63  ;;  %v932_v6 = vpop.f32.mrb[2].mxu1  ;;  %v685_v9 = vadd.f32 %v909_v3, %v839_v0 }
  0xfe   : > { %v933_v8 = vpop.f32.mrb[3].mxu1 }
  0xff   : > { %v725_v10 = vadd.f32 %v931_v5, %v685_v9 }
 0x119   : > { %v951_v11 = vpop.f32.mrb[4].mxu0 }
 0x11a   : > { %v952_v12 = vpop.f32.mrb[5].mxu0 }
 0x11b   : > { %v953_v13 = vadd.f32 %v952_v12, %v951_v11  ;;  %v954_v14 = vpop.f32.mrb[6].mxu0 }
 0x11c   : > { %v955_v15 = vpop.f32.mrb[7].mxu0 }
 0x11d   : > { %v765_v16 = vadd.f32 %v953_v13, %v725_v10 }
 0x11f   : > { %v772_v18 = vrot.slane %v765_v16, 7 }
 0x121   : > { %v775_v20 = vsel %vm774_vm0, %v770_v17, %v772_v18 }
 0x122   : > { %v777_v21 = vadd.f32 %v776_v19, %v775_v20 }
 0x124   : > { %778 = vst [vmem:[%s222_s13] sm:$0x1f] %v777_v21 }
 0x125 PF: > { %s15_s18 = sadd.s32 1, %s1022_s18  }
 0x126   : > { %p12_p4 = scmp.ge.s32.totalorder %s15_s18, 4  }
 0x128   :  { %14 = sbr.rel (!%p12_p4) target bundleno = 1 (0x1), region = 70 }

// kernel: _lambda_.5
= control target key start
LH: loop header
LB: loop body
LE: loop exit
PB: predicated region body
PF: predicated region fallthrough
CT: control target
= control target key end

     0   :  { %s922_s12 = smov 0   ;;  %s1019_s0 = inlined_call_operand.vmem [shape: f32[2,5,128], index: 0, kind: input, shape index: {}]   ;;  %s1020_s1 = inlined_call_operand.vmem [shape: bf16[128,256], index: 1, kind: input, shape index: {}]   ;;  %s1021_s2 = inlined_call_operand.vmem [shape: f32[8,384], index: 2, kind: input, shape index: {}]   ;;  %s1022_s3 = inlined_call_operand.vmem [shape: f32[2,4,5], index: 3, kind: output, shape index: {}]  }
   0x1 LB: > { %s771_s13 = sadd.s32 4294967295, %s894_s12   ;;  %p775_p0 = scmp.ge.s32.totalorder %s894_s12, 1  ;;  %s894_s12 = sphi %s922_s12, %s13_s12  }
   0x2   : > { %p136_p1 = scmp.lt.s32.totalorder %s894_s12, 3 }
   0x4   : > { %p137_p2 = pnand %p775_p0, %p136_p1 }
   0x5   : > { %p158_p3 = scmp.lt.s32.totalorder (!%p137_p2), %s771_s13, 1  ;;  %vm170_vm0 = vcmask (!%p137_p2), 1044480   ;;  %v846_v2 = vld [vmem:[%s1020_s1 + $0x4] ss:$8 sps:$4 sm:$0xff] (!%p137_p2)   ;;  %v848_v3 = vld [vmem:[%s1020_s1] ss:$8 sps:$4 sm:$0xff] (!%p137_p2)   ;;  %v185_v24 = vlaneseq (!%p137_p2) }
   0x6   : > { %140 = sbr.rel (%p137_p2) target bundleno = 1209 (0x4b9), region = 32  ;;  %v849_v4 = vld [vmem:[%s1020_s1 + $0x14] ss:$8 sps:$4 sm:$0xff] (!%p137_p2)   ;;  %300 = vmatprep.subr.bf16.mxu0 (!%p137_p2), %v846_v2  ;;  %v851_v5 = vld [vmem:[%s1020_s1 + $0x10] ss:$8 sps:$4 sm:$0xff] (!%p137_p2)   ;;  %v896_v18 = vmov (!%p137_p2), 0  }
   0x7   : > { %301 = vmatpush1.bf16.msra.mxu0 (!%p137_p2), %v848_v3  ;;  %v852_v6 = vld [vmem:[%s1020_s1 + $0x24] ss:$8 sps:$4 sm:$0xff] (!%p137_p2)   ;;  %v854_v12 = vld [vmem:[%s1020_s1 + $0x20] ss:$8 sps:$4 sm:$0xff] (!%p137_p2)   ;;  %v855_v13 = vld [vmem:[%s1020_s1 + $0x34] ss:$8 sps:$4 sm:$0xff] (!%p137_p2)   ;;  %332 = vmatprep.mubr.bf16.mxu0 (!%p137_p2), %v896_v18 }
   0x8   : > { %302 = vmatprep.subr.bf16.mxu0 (!%p137_p2), %v849_v4  ;;  %v857_v14 = vld [vmem:[%s1020_s1 + $0x30] ss:$8 sps:$4 sm:$0xff] (!%p137_p2)   ;;  %v858_v15 = vld [vmem:[%s1020_s1 + $0x44] ss:$8 sps:$4 sm:$0xff] (!%p137_p2)   ;;  %v860_v16 = vld [vmem:[%s1020_s1 + $0x40] ss:$8 sps:$4 sm:$0xff] (!%p137_p2)  }
   0x9   : > { %v861_v17 = vld [vmem:[%s1020_s1 + $0x54] ss:$8 sps:$4 sm:$0xff] (!%p137_p2)   ;;  %v863_v19 = vld [vmem:[%s1020_s1 + $0x50] ss:$8 sps:$4 sm:$0xff] (!%p137_p2)   ;;  %v864_v20 = vld [vmem:[%s1020_s1 + $0x64] ss:$8 sps:$4 sm:$0xff] (!%p137_p2)  }
   0xa   : > { %v866_v21 = vld [vmem:[%s1020_s1 + $0x60] ss:$8 sps:$4 sm:$0xff] (!%p137_p2)   ;;  %v867_v22 = vld [vmem:[%s1020_s1 + $0x74] ss:$8 sps:$4 sm:$0xff] (!%p137_p2)   ;;  %v869_v23 = vld [vmem:[%s1020_s1 + $0x70] ss:$8 sps:$4 sm:$0xff] (!%p137_p2)  }
   0xb   : > { %303 = vmatpush1.bf16.msra.mxu0 (!%p137_p2), %v851_v5  ;;  %v186_v25 = vshrl.u32 (!%p137_p2), %v185_v24, 7  ;;  %v168_v27 = vld [vmem:[%s1021_s2] sm:$0xff] (!%p137_p2)  ;;  %v897_v41 = vmov (!%p137_p2), 0.0   ;;  %vm898_vm1 = vmmov (!%p137_p2), 0   ;;  %v169_v42 = vld [vmem:[%s1021_s2 + $0x8] sm:$0xff] (!%p137_p2)  ;;  %vm341_vm2 = vcmask (!%p137_p2), 261120  }
   0xc   : > { %304 = vmatprep.subr.bf16.mxu0 (!%p137_p2), %v852_v6  ;;  %812 = vmatprep.subr.mxu1 (!%p137_p2), %v897_v41  ;;  %s899_s29 = smov (!%p137_p2), 96   ;;  %s900_s30 = smov (!%p137_p2), 64   ;;  %vm419_vm3 = vcmask (!%p137_p2), 32768   ;;  %vm710_vm4 = vcmask (!%p137_p2), 1040384   ;;  %vm712_vm5 = vcmask (!%p137_p2), 1041408   ;;  %vm714_vm6 = vcmask (!%p137_p2), 1042432  }
   0xd   : > { %s1024_s13 = smov (!%p158_p3, %s771_s13), 1  ;;  %v214_v26 = vsub.s32 2, %v186_v25  ;;  %v187_v32 = vsub.s32 0, %v186_v25  ;;  %v192_v33 = vsub.s32 1, %v186_v25  ;;  %814 = vmatprep.mubr.msk.f32.mxu1 %vm898_vm1, %v897_v41  ;;  %s901_s4 = smov 32   ;;  %vm716_vm7 = vcmask 35840  }
   0xe   : > { %s776_s14 = sshll.u32 %s1024_s13, 3  ;;  %s777_s5 = sshll.u32 %s1024_s13, 2 }
   0xf   : > { %s161_s17 = scalar_lea.vmem %s1019_s0, %s776_s14  ;;  %305 = vmatpush1.bf16.msra.mxu0 %v854_v12  ;;  %v215_v28 = vrot.slane %v168_v27, %v214_v26  ;;  %v188_v34 = vrot.slane %v168_v27, %v187_v32  ;;  %v193_v37 = vrot.slane %v168_v27, %v192_v33  ;;  %v219_v43 = vrot.slane %v169_v42, %v214_v26  ;;  %s165_s8 = scalar_lea.vmem %s1022_s3, %s777_s5 }
  0x10   : > { %v167_v0 = vld [vmem:[%s161_s17] sm:$0x1f]  ;;  %306 = vmatprep.subr.bf16.mxu0 %v855_v13 }
  0x11   : > { %v171_v1 = vsel %vm170_vm0, %v167_v0, 0.0 }
  0x12   : > { %172 = vadd.xlane.f32.xlu0 %v171_v1 }
  0x13   : > { %307 = vmatpush1.bf16.msra.mxu0 %v857_v14 }
  0x14   : > { %308 = vmatprep.subr.bf16.mxu0 %v858_v15 }
  0x17   : > { %309 = vmatpush1.bf16.msra.mxu0 %v860_v16 }
  0x18   : > { %310 = vmatprep.subr.bf16.mxu0 %v861_v17 }
  0x1b   : > { %311 = vmatpush1.bf16.msra.mxu0 %v863_v19 }
  0x1c   : > { %312 = vmatprep.subr.bf16.mxu0 %v864_v20 }
  0x1f   : > { %313 = vmatpush1.bf16.msra.mxu0 %v866_v21 }
  0x20   : > { %314 = vmatprep.subr.bf16.mxu0 %v867_v22 }
  0x23   : > { %315 = vmatpush1.bf16.msra.mxu0 %v869_v23 }
  0x9f   : > { %v173_v7 = vpop.xlane.xlu0 %172 }
  0xa0   : > { %v175_v8 = vmul.f32 0.0078125, %v173_v7 }
  0xa2   : > { %v176_v9 = vsub.f32 %v167_v0, %v175_v8 }
  0xa4   : > { %v177_v10 = vmul.f32 %v176_v9, %v176_v9 }
  0xa6   : > { %v178_v11 = vsel %vm170_vm0, %v177_v10, 0.0 }
  0xa7   : > { %179 = vadd.xlane.f32.xlu0 %v178_v11 }
 0x134   : > { %v180_v29 = vpop.xlane.xlu0 %179 }
 0x135   : > { %v181_v30 = vmul.f32 0.0078125, %v180_v29 }
 0x137   : > { %v182_v31 = vadd.f32 1e-06, %v181_v30 }
 0x139   : > { %870 = vrsqrt.f32 %v182_v31 }
 0x143   : > { %v871_v35 = vpop.eup %870 }
 0x144   : > { %v184_v36 = vmul.f32 %v871_v35, %v176_v9 }
 0x146   : > { %v189_v38 = vmul.f32 %v188_v34, %v184_v36 }
 0x148   : > { %v194_v39 = vadd.f32 %v193_v37, %v189_v38 }
 0x14a   : > { %v195_v40 = vpack.c.bf16 %v194_v39, %v194_v39 }
 0x14c   : > { %333 = vmatmul.mubr.bf16.vlgmr.msra.gmra.mrb[0].mxu0 %v195_v40 }
 0x21f   : > { %v334_v44 = vpop.f32.mrb[0].mxu0 }
 0x220   : > { %v335_v45 = vadd.f32 %v334_v44, %v215_v28  ;;  %v336_v46 = vpop.f32.mrb[1].mxu0 }
 0x221   : > { %v337_v47 = vadd.f32 %v336_v46, %v219_v43  ;;  %v338_v48 = vpop.f32.mrb[2].mxu0 }
 0x222   : > { %v339_v49 = vpop.f32.mrb[3].mxu0  ;;  %431 = vrot.lane.b32.xlu1 %v335_v45, %s899_s29 }
 0x223   : > { %523 = vrot.lane.b32.xlu0 %v337_v47, %s900_s30  ;;  %813 = vmatpush3.xpose.msk.msra.mxu1 %vm341_vm2, %v337_v47 }
 0x224   : > { %817 = vmatprep.subr.mxu1 %v897_v41 }
 0x226   : > { %433 = vrot.lane.b32.xlu1 %v337_v47, %s899_s29  ;;  %815 = vmatmul.mubr.msk.f32.vlgmr.msra.gmra.mrb[0].mxu1 %vm341_vm2, %v335_v45 }
 0x227   : > { %819 = vmatprep.mubr.msk.f32.mxu1 %vm898_vm1, %v897_v41 }
 0x22a   : > { %521 = vrot.lane.b32.xlu1 %v335_v45, %s900_s30 }
 0x22e   : > { %613 = vrot.lane.b32.xlu1 %v337_v47, %s901_s4 }
 0x232   : > { %611 = vrot.lane.b32.xlu1 %v335_v45, %s901_s4 }
 0x294   : > { %v432_v50 = vpop.permute.xlu1 %431 }
 0x295   : > { %v524_v52 = vpop.permute.xlu0 %523 }
 0x298   : > { %v434_v51 = vpop.permute.xlu1 %433 }
 0x299   : > { %818 = vmatpush3.xpose.msk.msra.mxu1 %vm341_vm2, %v434_v51 }
 0x29a   : > { %822 = vmatprep.subr.mxu1 %v897_v41 }
 0x29c   : > { %v522_v53 = vpop.permute.xlu1 %521  ;;  %820 = vmatmul.mubr.msk.f32.vlgmr.msra.gmra.mrb[2].mxu1 %vm341_vm2, %v432_v50 }
 0x29d   : > { %823 = vmatpush3.xpose.msk.msra.mxu1 %vm341_vm2, %v524_v52  ;;  %824 = vmatprep.mubr.msk.f32.mxu1 %vm898_vm1, %v897_v41 }
 0x29e   : > { %827 = vmatprep.subr.mxu1 %v897_v41 }
 0x2a0   : > { %v614_v54 = vpop.permute.xlu1 %613  ;;  %825 = vmatmul.mubr.msk.f32.vlgmr.msra.gmra.mrb[4].mxu1 %vm341_vm2, %v522_v53 }
 0x2a1   : > { %828 = vmatpush3.xpose.msk.msra.mxu1 %vm341_vm2, %v614_v54  ;;  %829 = vmatprep.mubr.msk.f32.mxu1 %vm898_vm1, %v897_v41 }
 0x2a4   : > { %v612_v55 = vpop.permute.xlu1 %611 }
 0x2a5   : > { %830 = vmatmul.mubr.msk.f32.vlgmr.msra.gmra.mrb[6].mxu1 %vm341_vm2, %v612_v55 }
 0x2f9   : > { %v414_v56 = vpop.f32.mrb[0].mxu1 }
 0x2fa   : > { %v816_v57 = vpop.f32.mrb[1].mxu1  ;;  %v418_v61 = vmul.f32 0.17677669, %v414_v56 }
 0x2fc   : > { %v420_v2 = vsel %vm419_vm3, %v418_v61, -inf }
 0x36f   : > { %v505_v58 = vpop.f32.mrb[2].mxu1 }
 0x370   : > { %v509_v59 = vmul.f32 0.17677669, %v505_v58  ;;  %v821_v60 = vpop.f32.mrb[3].mxu1 }
 0x372   : > { %v510_v62 = vsel %vm419_vm3, %v509_v59, -inf }
 0x373   : > { %511 = vmax.xlane.f32.xlu1 %v510_v62  ;;  %v595_v63 = vpop.f32.mrb[4].mxu1 }
 0x374   : > { %v599_v0 = vmul.f32 0.17677669, %v595_v63  ;;  %v826_v1 = vpop.f32.mrb[5].mxu1 }
 0x376   : > { %v600_v3 = vsel %vm419_vm3, %v599_v0, -inf }
 0x377   : > { %421 = vmax.xlane.f32.xlu1 %v420_v2  ;;  %601 = vmax.xlane.f32.xlu0 %v600_v3 }
 0x378   : > { %v685_v4 = vpop.f32.mrb[6].mxu1 }
 0x379   : > { %v689_v5 = vmul.f32 0.17677669, %v685_v4  ;;  %v831_v6 = vpop.f32.mrb[7].mxu1 }
 0x37b   : > { %v690_v7 = vsel %vm419_vm3, %v689_v5, -inf }
 0x37c   : > { %691 = vmax.xlane.f32.xlu1 %v690_v7 }
 0x400   : > { %v512_v8 = vpop.xlane.xlu1 %511 }
 0x401   : > { %v513_v9 = vsub.f32 %v509_v59, %v512_v8 }
 0x403   : > { %v514_v10 = vmul.f32 1.442695, %v513_v9 }
 0x404   : > { %v422_v11 = vpop.xlane.xlu1 %421  ;;  %v602_v12 = vpop.xlane.xlu0 %601 }
 0x405   : > { %872 = vpow2.f32 %v514_v10  ;;  %v423_v13 = vsub.f32 %v418_v61, %v422_v11  ;;  %v603_v14 = vsub.f32 %v599_v0, %v602_v12 }
 0x407   : > { %v424_v15 = vmul.f32 1.442695, %v423_v13  ;;  %v604_v16 = vmul.f32 1.442695, %v603_v14 }
 0x409   : > { %874 = vpow2.f32 %v424_v15  ;;  %v692_v17 = vpop.xlane.xlu1 %691 }
 0x40a   : > { %876 = vpow2.f32 %v604_v16  ;;  %v693_v18 = vsub.f32 %v689_v5, %v692_v17 }
 0x40c   : > { %v694_v19 = vmul.f32 1.442695, %v693_v18 }
 0x40e   : > { %878 = vpow2.f32 %v694_v19 }
 0x40f   : > { %v873_v20 = vpop.eup %872 }
 0x410   : > { %v516_v21 = vsel %vm419_vm3, %v873_v20, 0.0 }
 0x411   : > { %517 = vadd.xlane.f32.xlu0 %v516_v21 }
 0x413   : > { %v875_v22 = vpop.eup %874 }
 0x414   : > { %v877_v23 = vpop.eup %876  ;;  %v426_v24 = vsel %vm419_vm3, %v875_v22, 0.0 }
 0x415   : > { %427 = vadd.xlane.f32.xlu0 %v426_v24  ;;  %v606_v25 = vsel %vm419_vm3, %v877_v23, 0.0 }
 0x416   : > { %607 = vadd.xlane.f32.xlu1 %v606_v25 }
 0x418   : > { %v879_v26 = vpop.eup %878 }
 0x419   : > { %v696_v27 = vsel %vm419_vm3, %v879_v26, 0.0 }
 0x41a   : > { %697 = vadd.xlane.f32.xlu1 %v696_v27 }
 0x49e   : > { %v518_v28 = vpop.xlane.xlu0 %517 }
 0x49f   : > { %880 = vrcp.f32 %v518_v28 }
 0x4a2   : > { %v428_v29 = vpop.xlane.xlu0 %427 }
 0x4a3   : > { %882 = vrcp.f32 %v428_v29  ;;  %v608_v30 = vpop.xlane.xlu1 %607 }
 0x4a4   : > { %884 = vrcp.f32 %v608_v30 }
 0x4a7   : > { %v698_v31 = vpop.xlane.xlu1 %697 }
 0x4a8   : > { %886 = vrcp.f32 %v698_v31 }
 0x4a9   : > { %v881_v32 = vpop.eup %880 }
 0x4aa   : > { %v520_v34 = vmul.f32 %v881_v32, %v873_v20 }
 0x4ac   : > { %v702_v38 = vrot.slane %v520_v34, 7 }
 0x4ad   : > { %v883_v33 = vpop.eup %882 }
 0x4ae   : > { %v885_v35 = vpop.eup %884  ;;  %v430_v36 = vmul.f32 %v883_v33, %v875_v22 }
 0x4af   : > { %v610_v37 = vmul.f32 %v885_v35, %v877_v23 }
 0x4b0   : > { %v711_v41 = vsel %vm710_vm4, %v430_v36, %v702_v38 }
 0x4b1   : > { %v705_v40 = vrot.slane %v610_v37, 6 }
 0x4b2   : > { %v887_v39 = vpop.eup %886 }
 0x4b3   : > { %v700_v42 = vmul.f32 %v887_v39, %v879_v26  ;;  %v713_v44 = vsel %vm712_vm5, %v711_v41, %v705_v40 }
 0x4b5   : > { %v708_v43 = vrot.slane %v700_v42, 5 }
 0x4b7   : > { %v715_v45 = vsel %vm714_vm6, %v713_v44, %v708_v43 }
 0x4b8   : > { %717 = vst.msk [vmem:[%s165_s8] sm:$0xf] %vm716_vm7, %v715_v45 }
 0x4b9 PF: > { %s13_s12 = sadd.s32 1, %s894_s12  }
 0x4ba   : > { %p10_p4 = scmp.ge.s32.totalorder %s13_s12, 4  }
 0x4bc   :  { %12 = sbr.rel (!%p10_p4) target bundleno = 1 (0x1), region = 62 }

// kernel: _lambda_.4
= control target key start
LH: loop header
LB: loop body
LE: loop exit
PB: predicated region body
PF: predicated region fallthrough
CT: control target
= control target key end

     0   :  { %s2029_s21 = smov 0   ;;  %s2386_s0 = inlined_call_operand.vmem [shape: f32[2,5,128], index: 0, kind: input, shape index: {}]   ;;  %s2387_s1 = inlined_call_operand.vmem [shape: bf16[128,384], index: 1, kind: input, shape index: {}]   ;;  %s2388_s2 = inlined_call_operand.vmem [shape: bf16[128,128], index: 2, kind: input, shape index: {}]   ;;  %s2389_s3 = inlined_call_operand.vmem [shape: bf16[128,256], index: 3, kind: input, shape index: {}]   ;;  %s2390_s4 = inlined_call_operand.vmem [shape: bf16[256,128], index: 4, kind: input, shape index: {}]   ;;  %s2391_s5 = inlined_call_operand.vmem [shape: f32[8,384], index: 5, kind: input, shape index: {}]   ;;  %s2392_s6 = inlined_call_operand.vmem [shape: f32[2,5,128], index: 6, kind: output, shape index: {}]  }
   0x1 LB: > { %s1635_s22 = sadd.s32 4294967295, %s1985_s21   ;;  %p1639_p0 = scmp.ge.s32.totalorder %s1985_s21, 1  ;;  %s1985_s21 = sphi %s2029_s21, %s16_s21  }
   0x2   : > { %p211_p1 = scmp.lt.s32.totalorder %s1985_s21, 3 }
   0x4   : > { %p212_p2 = pnand %p1639_p0, %p211_p1 }
   0x5   : > { %p239_p3 = scmp.lt.s32.totalorder (!%p212_p2), %s1635_s22, 1  ;;  %vm252_vm0 = vcmask (!%p212_p2), 1044480   ;;  %v1875_v2 = vld [vmem:[%s2387_s1 + $0x4] ss:$12 sps:$4 sm:$0xff] (!%p212_p2)   ;;  %v1877_v3 = vld [vmem:[%s2387_s1] ss:$12 sps:$4 sm:$0xff] (!%p212_p2)   ;;  %v267_v35 = vlaneseq (!%p212_p2) }
   0x6   : > { %215 = sbr.rel (%p212_p2) target bundleno = 3486 (0xd9e), region = 44  ;;  %v1987_v4 = vmov (!%p212_p2), 0.0   ;;  %v1878_v5 = vld [vmem:[%s2387_s1 + $0x8] ss:$12 sps:$4 sm:$0xff] (!%p212_p2)   ;;  %v1881_v7 = vld [vmem:[%s2387_s1 + $0x18] ss:$12 sps:$4 sm:$0xff] (!%p212_p2)   ;;  %450 = vmatprep.subr.bf16.mxu0 (!%p212_p2), %v1875_v2 }
   0x7   : > { %1776 = vmatprep.subr.bf16.mxu1 (!%p212_p2), %v1987_v4  ;;  %v1879_v6 = vld [vmem:[%s2387_s1 + $0x1c] ss:$12 sps:$4 sm:$0xff] (!%p212_p2)   ;;  %v1882_v8 = vld [vmem:[%s2387_s1 + $0x20] ss:$12 sps:$4 sm:$0xff] (!%p212_p2)   ;;  %451 = vmatpush1.bf16.msra.mxu0 (!%p212_p2), %v1877_v3  ;;  %v1886_v16 = vld [vmem:[%s2387_s1 + $0x38] ss:$12 sps:$4 sm:$0xff] (!%p212_p2)  }
   0x8   : > { %v1883_v9 = vld [vmem:[%s2387_s1 + $0x34] ss:$12 sps:$4 sm:$0xff] (!%p212_p2)   ;;  %1777 = vmatpush3.bf16.msra.mxu1 (!%p212_p2), %v1878_v5  ;;  %452 = vmatprep.subr.bf16.mxu0 (!%p212_p2), %v1879_v6  ;;  %v1885_v15 = vld [vmem:[%s2387_s1 + $0x30] ss:$12 sps:$4 sm:$0xff] (!%p212_p2)   ;;  %v1887_v17 = vld [vmem:[%s2387_s1 + $0x4c] ss:$12 sps:$4 sm:$0xff] (!%p212_p2)  }
   0x9   : > { %1778 = vmatprep.subr.bf16.mxu1 (!%p212_p2), %v1987_v4  ;;  %v1889_v18 = vld [vmem:[%s2387_s1 + $0x48] ss:$12 sps:$4 sm:$0xff] (!%p212_p2)   ;;  %v1890_v19 = vld [vmem:[%s2387_s1 + $0x50] ss:$12 sps:$4 sm:$0xff] (!%p212_p2)   ;;  %v1893_v21 = vld [vmem:[%s2387_s1 + $0x60] ss:$12 sps:$4 sm:$0xff] (!%p212_p2)  }
   0xa   : > { %v1891_v20 = vld [vmem:[%s2387_s1 + $0x64] ss:$12 sps:$4 sm:$0xff] (!%p212_p2)   ;;  %v1894_v22 = vld [vmem:[%s2387_s1 + $0x68] ss:$12 sps:$4 sm:$0xff] (!%p212_p2)   ;;  %v1898_v25 = vld [vmem:[%s2387_s1 + $0x80] ss:$12 sps:$4 sm:$0xff] (!%p212_p2)  }
   0xb   : > { %453 = vmatpush1.bf16.msra.mxu0 (!%p212_p2), %v1881_v7  ;;  %v1895_v23 = vld [vmem:[%s2387_s1 + $0x7c] ss:$12 sps:$4 sm:$0xff] (!%p212_p2)   ;;  %v1897_v24 = vld [vmem:[%s2387_s1 + $0x78] ss:$12 sps:$4 sm:$0xff] (!%p212_p2)   ;;  %v1899_v26 = vld [vmem:[%s2387_s1 + $0x94] ss:$12 sps:$4 sm:$0xff] (!%p212_p2)  }
   0xc   : > { %1779 = vmatpush3.bf16.msra.mxu1 (!%p212_p2), %v1882_v8  ;;  %454 = vmatprep.subr.bf16.mxu0 (!%p212_p2), %v1883_v9  ;;  %v1988_v27 = vmov (!%p212_p2), 0   ;;  %vm1989_vm1 = vmmov (!%p212_p2), 0   ;;  %v1901_v28 = vld [vmem:[%s2387_s1 + $0x90] ss:$12 sps:$4 sm:$0xff] (!%p212_p2)   ;;  %v1902_v29 = vld [vmem:[%s2387_s1 + $0x98] ss:$12 sps:$4 sm:$0xff] (!%p212_p2)  }
   0xd   : > { %s2394_s22 = smov (!%p239_p3, %s1635_s22), 1  ;;  %1780 = vmatprep.subr.bf16.mxu1 %v1987_v4  ;;  %482 = vmatprep.mubr.bf16.mxu0 %v1988_v27  ;;  %v1903_v30 = vld [vmem:[%s2387_s1 + $0xac] ss:$12 sps:$4 sm:$0xff]   ;;  %v1905_v31 = vld [vmem:[%s2387_s1 + $0xa8] ss:$12 sps:$4 sm:$0xff]   ;;  %v2136_v37 = vshrl.u32 %v267_v35, 7 }
   0xe   : > { %s1640_s23 = sshll.u32 %s2394_s22, 3  ;;  %1792 = vmatprep.mubr.msk.bf16.mxu1 %vm1989_vm1, %v1987_v4  ;;  %v1906_v32 = vld [vmem:[%s2387_s1 + $0xb0] ss:$12 sps:$4 sm:$0xff]   ;;  %v2142_v39 = vld [vmem:[%s2391_s5] sm:$0xff]  ;;  %v2158_v50 = vld [vmem:[%s2391_s5 + $0x8] sm:$0xff]  ;;  %vm627_vm2 = vcmask 1041408  }
   0xf   : > { %s242_s26 = scalar_lea.vmem %s2386_s0, %s1640_s23  ;;  %455 = vmatpush1.bf16.msra.mxu0 %v1885_v15  ;;  %v269_v38 = vsub.s32 0, %v2136_v37  ;;  %v274_v40 = vsub.s32 1, %v2136_v37  ;;  %v312_v48 = vsub.s32 2, %v2136_v37  ;;  %v251_v49 = vld [vmem:[%s2391_s5 + $0x10] sm:$0xff]  ;;  %vm628_vm3 = vcmask 1042432   ;;  %s1991_s15 = smov 96  }
  0x10   : > { %v2045_v0 = vld [vmem:[%s242_s26] sm:$0x1f]  ;;  %1781 = vmatpush3.bf16.msra.mxu1 %v1886_v16  ;;  %456 = vmatprep.subr.bf16.mxu0 %v1887_v17  ;;  %v1990_v53 = vmov 65535   ;;  %vm531_vm4 = vcmask 261120   ;;  %vm609_vm5 = vcmask 36864   ;;  %vm623_vm6 = vcmask 39936  }
  0x11   : > { %v253_v1 = vsel %vm252_vm0, %v2045_v0, 0.0  ;;  %1782 = vmatprep.subr.bf16.mxu1 %v1987_v4  ;;  %v270_v41 = vrot.slane %v2142_v39, %v269_v38  ;;  %v275_v44 = vrot.slane %v2142_v39, %v274_v40  ;;  %v321_v51 = vrot.slane %v251_v49, %v312_v48  ;;  %s1992_s16 = smov 64   ;;  %s1993_s17 = smov 32  }
  0x12   : > { %254 = vadd.xlane.f32.xlu0 %v253_v1  ;;  %v317_v52 = vrot.slane %v2158_v50, %v312_v48  ;;  %v629_v54 = vsel %vm627_vm2, 4294967295, %v1990_v53  ;;  %v313_v57 = vrot.slane %v2142_v39, %v312_v48  ;;  %vm1105_vm7 = vcmask 523264  }
  0x13   : > { %457 = vmatpush1.bf16.msra.mxu0 %v1889_v18  ;;  %v2162_v1 = vsel %vm628_vm3, %v629_v54, 0  ;;  %vm1107_vm8 = vcmask 785408  }
  0x14   : > { %1783 = vmatpush3.bf16.msra.mxu1 %v1890_v19  ;;  %458 = vmatprep.subr.bf16.mxu0 %v1891_v20 }
  0x15   : > { %1784 = vmatprep.subr.bf16.mxu1 %v1987_v4 }
  0x17   : > { %459 = vmatpush1.bf16.msra.mxu0 %v1893_v21 }
  0x18   : > { %1785 = vmatpush3.bf16.msra.mxu1 %v1894_v22  ;;  %460 = vmatprep.subr.bf16.mxu0 %v1895_v23 }
  0x19   : > { %1786 = vmatprep.subr.bf16.mxu1 %v1987_v4 }
  0x1b   : > { %461 = vmatpush1.bf16.msra.mxu0 %v1897_v24 }
  0x1c   : > { %1787 = vmatpush3.bf16.msra.mxu1 %v1898_v25  ;;  %462 = vmatprep.subr.bf16.mxu0 %v1899_v26 }
  0x1d   : > { %1788 = vmatprep.subr.bf16.mxu1 %v1987_v4 }
  0x1f   : > { %463 = vmatpush1.bf16.msra.mxu0 %v1901_v28 }
  0x20   : > { %1789 = vmatpush3.bf16.msra.mxu1 %v1902_v29  ;;  %464 = vmatprep.subr.bf16.mxu0 %v1903_v30 }
  0x21   : > { %1790 = vmatprep.subr.bf16.mxu1 %v1987_v4 }
  0x23   : > { %465 = vmatpush1.bf16.msra.mxu0 %v1905_v31 }
  0x24   : > { %1791 = vmatpush3.bf16.msra.mxu1 %v1906_v32  ;;  %1796 = vmatprep.subr.mxu0 %v1987_v4 }
  0x25   : > { %1823 = vmatprep.subr.bf16.mxu1 %v1987_v4 }
  0x9f   : > { %v255_v10 = vpop.xlane.xlu0 %254 }
  0xa0   : > { %v257_v11 = vmul.f32 0.0078125, %v255_v10 }
  0xa2   : > { %v258_v12 = vsub.f32 %v2045_v0, %v257_v11 }
  0xa4   : > { %v259_v13 = vmul.f32 %v258_v12, %v258_v12 }
  0xa6   : > { %v260_v14 = vsel %vm252_vm0, %v259_v13, 0.0 }
  0xa7   : > { %261 = vadd.xlane.f32.xlu0 %v260_v14 }
 0x134   : > { %v262_v33 = vpop.xlane.xlu0 %261 }
 0x135   : > { %v263_v34 = vmul.f32 0.0078125, %v262_v33 }
 0x137   : > { %v264_v36 = vadd.f32 1e-06, %v263_v34 }
 0x139   : > { %1955 = vrsqrt.f32 %v264_v36 }
 0x143   : > { %v1956_v42 = vpop.eup %1955 }
 0x144   : > { %v266_v43 = vmul.f32 %v1956_v42, %v258_v12 }
 0x146   : > { %v271_v45 = vmul.f32 %v270_v41, %v266_v43 }
 0x148   : > { %v276_v46 = vadd.f32 %v275_v44, %v271_v45 }
 0x14a   : > { %v277_v47 = vpack.c.bf16 %v276_v46, %v276_v46 }
 0x14c   : > { %483 = vmatmul.mubr.bf16.vlgmr.msra.gmra.mrb[0].mxu0 %v277_v47  ;;  %1793 = vmatmul.mubr.bf16.vlgmr.msra.gmra.mrb[0].mxu1 %v277_v47 }
 0x14d   : > { %1798 = vmatprep.mubr.msk.f32.mxu0 %vm1989_vm1, %v1987_v4  ;;  %1825 = vmatprep.mubr.msk.bf16.mxu1 %vm1989_vm1, %v1987_v4 }
 0x21f   : > { %v484_v55 = vpop.f32.mrb[0].mxu0  ;;  %v525_v56 = vpop.f32.mrb[0].mxu1 }
 0x220   : > { %v526_v58 = vadd.f32 %v525_v56, %v321_v51  ;;  %v486_v59 = vpop.f32.mrb[1].mxu0  ;;  %v1794_v60 = vpop.f32.mrb[1].mxu1  ;;  %v485_v6 = vadd.f32 %v484_v55, %v313_v57 }
 0x221   : > { %v487_v61 = vadd.f32 %v486_v59, %v317_v52  ;;  %v488_v62 = vpop.f32.mrb[2].mxu0  ;;  %v528_v63 = vpop.f32.mrb[2].mxu1 }
 0x222   : > { %v2164_v2 = vpack.c.bf16 %v526_v58, %v526_v58  ;;  %v489_v3 = vpop.f32.mrb[3].mxu0  ;;  %v1795_v5 = vpop.f32.mrb[3].mxu1 }
 0x223   : > { %676 = vrot.lane.b32.xlu0 %v487_v61, %s1991_s15  ;;  %1797 = vmatpush3.xpose.msk.msra.mxu0 %vm531_vm4, %v487_v61 }
 0x224   : > { %1801 = vmatprep.subr.bf16.mxu0 %v1987_v4  ;;  %v632_v7 = vand.u32 %v2162_v1, %v2164_v2 }
 0x226   : > { %1799 = vmatmul.mubr.msk.f32.vlgmr.msra.gmra.mrb[4].mxu0 %vm531_vm4, %v485_v6 }
 0x227   : > { %1802 = vmatpush3.bf16.msra.mxu0 %v632_v7  ;;  %1803 = vmatprep.mubr.msk.bf16.mxu0 %vm1989_vm1, %v1987_v4 }
 0x228   : > { %1807 = vmatprep.subr.mxu0 %v1987_v4 }
 0x295   : > { %v677_v21 = vpop.permute.xlu0 %676 }
 0x2f9   : > { %v604_v8 = vpop.f32.mrb[4].mxu0 }
 0x2fa   : > { %v608_v9 = vmul.f32 0.17677669, %v604_v8  ;;  %v1800_v10 = vpop.f32.mrb[5].mxu0 }
 0x2fc   : > { %v610_v11 = vsel %vm609_vm5, %v608_v9, -inf }
 0x2fd   : > { %611 = vmax.xlane.f32.xlu1 %v610_v11 }
 0x38a   : > { %v612_v12 = vpop.xlane.xlu1 %611 }
 0x38b   : > { %v613_v13 = vsub.f32 %v608_v9, %v612_v12 }
 0x38d   : > { %v614_v14 = vmul.f32 1.442695, %v613_v13 }
 0x38f   : > { %1957 = vpow2.f32 %v614_v14 }
 0x399   : > { %v1958_v15 = vpop.eup %1957 }
 0x39a   : > { %v616_v16 = vsel %vm609_vm5, %v1958_v15, 0.0 }
 0x39b   : > { %617 = vadd.xlane.f32.xlu1 %v616_v16 }
 0x3ac   : > { %674 = vrot.lane.b32.xlu1 %v485_v6, %s1991_s15 }
 0x428   : > { %v618_v17 = vpop.xlane.xlu1 %617 }
 0x429   : > { %1959 = vrcp.f32 %v618_v17 }
 0x42c   : > { %v675_v22 = vpop.permute.xlu1 %674 }
 0x433   : > { %v1960_v18 = vpop.eup %1959 }
 0x434   : > { %v620_v19 = vmul.f32 %v1960_v18, %v1958_v15 }
 0x436   : > { %v621_v20 = vpack.c.bf16 %v620_v19, %v620_v19 }
 0x438   : > { %1804 = vmatmul.mubr.msk.bf16.vlgmr.msra.gmra.mrb[8].mxu0 %vm623_vm6, %v621_v20 }
 0x439   : > { %1808 = vmatpush3.xpose.msk.msra.mxu0 %vm531_vm4, %v677_v21  ;;  %1809 = vmatprep.mubr.msk.f32.mxu0 %vm1989_vm1, %v1987_v4 }
 0x43a   : > { %1812 = vmatprep.subr.bf16.mxu0 %v1987_v4 }
 0x440   : > { %1810 = vmatmul.mubr.msk.f32.vlgmr.msra.gmra.mrb[6].mxu0 %vm531_vm4, %v675_v22 }
 0x441   : > { %1814 = vmatprep.mubr.msk.bf16.mxu0 %vm1989_vm1, %v1987_v4 }
 0x50b   : > { %v2186_v23 = vpop.f32.mrb[8].mxu0 }
 0x50c   : > { %v1805_v24 = vpop.f32.mrb[9].mxu0 }
 0x50d   : > { %v671_v25 = vpop.f32.mrb[10].mxu0 }
 0x50e   : > { %v1806_v26 = vpop.f32.mrb[11].mxu0  ;;  %v1909_v25 = vld [vmem:[%s2388_s2 + $0x10] sm:$0xff]  }
 0x50f   : > { %v1911_v26 = vld [vmem:[%s2388_s2 + $0x20] sm:$0xff]  }
 0x513   : > { %v748_v28 = vpop.f32.mrb[6].mxu0 }
 0x514   : > { %v752_v29 = vmul.f32 0.17677669, %v748_v28  ;;  %v1811_v30 = vpop.f32.mrb[7].mxu0  ;;  %v1912_v28 = vld [vmem:[%s2388_s2 + $0x28] sm:$0xff]  }
 0x515   : > { %v1914_v30 = vld [vmem:[%s2388_s2 + $0x38] sm:$0xff]  }
 0x516   : > { %v753_v31 = vsel %vm609_vm5, %v752_v29, -inf }
 0x517   : > { %754 = vmax.xlane.f32.xlu1 %v753_v31 }
 0x528   : > { %816 = vrot.lane.b32.xlu1 %v487_v61, %s1992_s16 }
 0x52c   : > { %814 = vrot.lane.b32.xlu1 %v485_v6, %s1992_s16 }
 0x530   : > { %955 = vrot.lane.b32.xlu1 %v487_v61, %s1993_s17 }
 0x5a4   : > { %v755_v32 = vpop.xlane.xlu1 %754 }
 0x5a5   : > { %v756_v33 = vsub.f32 %v752_v29, %v755_v32  ;;  %v1913_v29 = vld [vmem:[%s2388_s2 + $0x30] sm:$0xff]  }
 0x5a7   : > { %v757_v34 = vmul.f32 1.442695, %v756_v33 }
 0x5a8   : > { %v817_v43 = vpop.permute.xlu1 %816 }
 0x5a9   : > { %1961 = vpow2.f32 %v757_v34 }
 0x5ac   : > { %v815_v46 = vpop.permute.xlu1 %814 }
 0x5b0   : > { %v956_v47 = vpop.permute.xlu1 %955 }
 0x5b3   : > { %v1962_v35 = vpop.eup %1961 }
 0x5b4   : > { %v759_v36 = vsel %vm609_vm5, %v1962_v35, 0.0 }
 0x5b5   : > { %760 = vadd.xlane.f32.xlu0 %v759_v36 }
 0x5cb   : > { %766 = vrot.lane.b32.xlu0 %v2164_v2, %s1991_s15 }
 0x5cf   : > { %953 = vrot.lane.b32.xlu0 %v485_v6, %s1993_s17 }
 0x642   : > { %v761_v38 = vpop.xlane.xlu0 %760 }
 0x643   : > { %1963 = vrcp.f32 %v761_v38 }
 0x646   : > { %v767_v40 = vpop.permute.xlu0 %766 }
 0x647   : > { %v772_v41 = vand.u32 %v767_v40, %v2162_v1 }
 0x649   : > { %1813 = vmatpush3.bf16.msra.mxu0 %v772_v41 }
 0x64a   : > { %1818 = vmatprep.subr.mxu0 %v1987_v4  ;;  %v954_v48 = vpop.permute.xlu0 %953 }
 0x64d   : > { %v1964_v42 = vpop.eup %1963 }
 0x64e   : > { %v763_v44 = vmul.f32 %v1964_v42, %v1962_v35 }
 0x650   : > { %v764_v45 = vpack.c.bf16 %v763_v44, %v763_v44 }
 0x652   : > { %1815 = vmatmul.mubr.msk.bf16.vlgmr.msra.gmra.mrb[12].mxu0 %vm623_vm6, %v764_v45 }
 0x653   : > { %1819 = vmatpush3.xpose.msk.msra.mxu0 %vm531_vm4, %v817_v43  ;;  %1820 = vmatprep.mubr.msk.f32.mxu0 %vm1989_vm1, %v1987_v4 }
 0x654   : > { %1829 = vmatprep.subr.mxu0 %v1987_v4 }
 0x65a   : > { %1821 = vmatmul.mubr.msk.f32.vlgmr.msra.gmra.mrb[16].mxu0 %vm531_vm4, %v815_v46 }
 0x65b   : > { %1830 = vmatpush3.xpose.msk.msra.mxu0 %vm531_vm4, %v956_v47  ;;  %1831 = vmatprep.mubr.msk.f32.mxu0 %vm1989_vm1, %v1987_v4  ;;  %v1128_v47 = vsub.s32 3, %v2136_v37 }
 0x65c   : > { %1834 = vmatprep.subr.bf16.mxu0 %v1987_v4 }
 0x65e   : > { %1832 = vmatmul.mubr.msk.f32.vlgmr.msra.gmra.mrb[18].mxu0 %vm531_vm4, %v954_v48  ;;  %v1129_v48 = vrot.slane %v2142_v39, %v1128_v47 }
 0x65f   : > { %1836 = vmatprep.mubr.msk.bf16.mxu0 %vm1989_vm1, %v1987_v4 }
 0x725   : > { %v808_v49 = vpop.f32.mrb[12].mxu0 }
 0x726   : > { %v1816_v51 = vpop.f32.mrb[13].mxu0 }
 0x727   : > { %v811_v52 = vpop.f32.mrb[14].mxu0 }
 0x728   : > { %v1817_v53 = vpop.f32.mrb[15].mxu0 }
 0x72d   : > { %v888_v54 = vpop.f32.mrb[16].mxu0 }
 0x72e   : > { %v892_v55 = vmul.f32 0.17677669, %v888_v54  ;;  %v1822_v56 = vpop.f32.mrb[17].mxu0 }
 0x72f   : > { %v1915_v56 = vld [vmem:[%s2389_s3] ss:$8 sps:$4 sm:$0xff]  }
 0x730   : > { %v893_v57 = vsel %vm609_vm5, %v892_v55, -inf }
 0x731   : > { %894 = vmax.xlane.f32.xlu1 %v893_v57  ;;  %v1027_v58 = vpop.f32.mrb[18].mxu0  ;;  %v1917_v57 = vld [vmem:[%s2389_s3 + $0x4] ss:$8 sps:$4 sm:$0xff]  }
 0x732   : > { %v1031_v59 = vmul.f32 0.17677669, %v1027_v58  ;;  %v1833_v60 = vpop.f32.mrb[19].mxu0  ;;  %v1920_v58 = vld [vmem:[%s2389_s3 + $0x14] ss:$8 sps:$4 sm:$0xff]  }
 0x733   : > { %v1921_v60 = vld [vmem:[%s2389_s3 + $0x20] ss:$8 sps:$4 sm:$0xff]  }
 0x734   : > { %v1032_v61 = vsel %vm609_vm5, %v1031_v59, -inf }
 0x735   : > { %1033 = vmax.xlane.f32.xlu0 %v1032_v61 }
 0x742   : > { %905 = vrot.lane.b32.xlu1 %v2164_v2, %s1992_s16 }
 0x746   : > { %1093 = vrot.lane.b32.xlu1 %v808_v49, %s1993_s17 }
 0x7be   : > { %v895_v62 = vpop.xlane.xlu1 %894 }
 0x7bf   : > { %v896_v63 = vsub.f32 %v892_v55, %v895_v62 }
 0x7c1   : > { %v897_v3 = vmul.f32 1.442695, %v896_v63 }
 0x7c2   : > { %v906_v5 = vpop.permute.xlu1 %905  ;;  %v1034_v6 = vpop.xlane.xlu0 %1033 }
 0x7c3   : > { %1965 = vpow2.f32 %v897_v3  ;;  %v911_v7 = vand.u32 %v906_v5, %v2162_v1  ;;  %v1035_v8 = vsub.f32 %v1031_v59, %v1034_v6  ;;  %v1923_v59 = vld [vmem:[%s2389_s3 + $0x24] ss:$8 sps:$4 sm:$0xff]   ;;  %v1926_v6 = vld [vmem:[%s2389_s3 + $0x34] ss:$8 sps:$4 sm:$0xff]  }
 0x7c5   : > { %v1036_v9 = vmul.f32 1.442695, %v1035_v8  ;;  %1824 = vmatpush3.bf16.msra.mxu1 %v911_v7  ;;  %v1924_v7 = vld [vmem:[%s2389_s3 + $0x30] ss:$8 sps:$4 sm:$0xff]   ;;  %v1929_v8 = vld [vmem:[%s2389_s3 + $0x44] ss:$8 sps:$4 sm:$0xff]  }
 0x7c6   : > { %1840 = vmatprep.subr.bf16.mxu1 %v1987_v4  ;;  %v1094_v41 = vpop.permute.xlu1 %1093 }
 0x7c7   : > { %1967 = vpow2.f32 %v1036_v9  ;;  %v1927_v9 = vld [vmem:[%s2389_s3 + $0x40] ss:$8 sps:$4 sm:$0xff]  }
 0x7cd   : > { %v1966_v10 = vpop.eup %1965 }
 0x7ce   : > { %v899_v11 = vsel %vm609_vm5, %v1966_v10, 0.0 }
 0x7cf   : > { %900 = vadd.xlane.f32.xlu0 %v899_v11  ;;  %v1930_v11 = vld [vmem:[%s2389_s3 + $0x50] ss:$8 sps:$4 sm:$0xff]  }
 0x7d1   : > { %v1968_v12 = vpop.eup %1967 }
 0x7d2   : > { %v1038_v13 = vsel %vm609_vm5, %v1968_v12, 0.0 }
 0x7d3   : > { %1039 = vadd.xlane.f32.xlu0 %v1038_v13  ;;  %v1933_v13 = vld [vmem:[%s2389_s3 + $0x60] ss:$8 sps:$4 sm:$0xff]  }
 0x7e9   : > { %1044 = vrot.lane.b32.xlu0 %v2164_v2, %s1993_s17  ;;  %v1908_v2 = vld [vmem:[%s2388_s2 + $0x8] sm:$0xff]  }
 0x85c   : > { %v901_v14 = vpop.xlane.xlu0 %900 }
 0x85d   : > { %1969 = vrcp.f32 %v901_v14  ;;  %v1938_v14 = vld [vmem:[%s2389_s3 + $0x74] ss:$8 sps:$4 sm:$0xff]  }
 0x860   : > { %v1040_v15 = vpop.xlane.xlu0 %1039 }
 0x861   : > { %1971 = vrcp.f32 %v1040_v15  ;;  %v1936_v15 = vld [vmem:[%s2389_s3 + $0x70] ss:$8 sps:$4 sm:$0xff]  }
 0x864   : > { %v1045_v16 = vpop.permute.xlu0 %1044 }
 0x865   : > { %v1050_v17 = vand.u32 %v1045_v16, %v2162_v1  ;;  %v1907_v1 = vld [vmem:[%s2388_s2] sm:$0xff]  }
 0x867   : > { %v1970_v18 = vpop.eup %1969  ;;  %1835 = vmatpush3.bf16.msra.mxu0 %v1050_v17 }
 0x868   : > { %v903_v19 = vmul.f32 %v1970_v18, %v1966_v10  ;;  %1347 = vmatprep.subr.bf16.mxu0 %v1917_v57  ;;  %v1932_v10 = vld [vmem:[%s2389_s3 + $0x54] ss:$8 sps:$4 sm:$0xff]  }
 0x86a   : > { %v904_v20 = vpack.c.bf16 %v903_v19, %v903_v19  ;;  %v1234_v19 = vsub.s32 4, %v2136_v37 }
 0x86b   : > { %v1972_v21 = vpop.eup %1971 }
 0x86c   : > { %v1042_v22 = vmul.f32 %v1972_v21, %v1968_v12  ;;  %1826 = vmatmul.mubr.msk.bf16.vlgmr.msra.gmra.mrb[4].mxu1 %vm623_vm6, %v904_v20  ;;  %v1935_v12 = vld [vmem:[%s2389_s3 + $0x64] ss:$8 sps:$4 sm:$0xff]   ;;  %v1239_v20 = vsub.s32 5, %v2136_v37  ;;  %v1235_v21 = vrot.slane %v2142_v39, %v1234_v19 }
 0x86d   : > { %1856 = vmatprep.mubr.msk.bf16.mxu1 %vm1989_vm1, %v1987_v4  ;;  %1841 = vmatpush3.bf16.msra.mxu1 %v1907_v1 }
 0x86e   : > { %v1043_v24 = vpack.c.bf16 %v1042_v22, %v1042_v22  ;;  %1842 = vmatprep.subr.bf16.mxu1 %v1987_v4  ;;  %v1240_v1 = vrot.slane %v2142_v39, %v1239_v20 }
 0x870   : > { %1837 = vmatmul.mubr.msk.bf16.vlgmr.msra.gmra.mrb[20].mxu0 %vm623_vm6, %v1043_v24 }
 0x871   : > { %1379 = vmatprep.mubr.bf16.mxu0 %v1988_v27  ;;  %1843 = vmatpush3.bf16.msra.mxu1 %v1908_v2  ;;  %v1910_v27 = vld [vmem:[%s2388_s2 + $0x18] sm:$0xff]  }
 0x872   : > { %1844 = vmatprep.subr.bf16.mxu1 %v1987_v4  ;;  %1348 = vmatpush1.bf16.msra.mxu0 %v1915_v56 }
 0x873   : > { %1349 = vmatprep.subr.bf16.mxu0 %v1920_v58 }
 0x875   : > { %1845 = vmatpush3.bf16.msra.mxu1 %v1909_v25 }
 0x876   : > { %1846 = vmatprep.subr.bf16.mxu1 %v1987_v4 }
 0x879   : > { %1847 = vmatpush3.bf16.msra.mxu1 %v1910_v27 }
 0x87a   : > { %1848 = vmatprep.subr.bf16.mxu1 %v1987_v4 }
 0x87d   : > { %1849 = vmatpush3.bf16.msra.mxu1 %v1911_v26  ;;  %v1939_v26 = vld [vmem:[%s2390_s4 + $0x40] sm:$0xff]  }
 0x87e   : > { %1850 = vmatprep.subr.bf16.mxu1 %v1987_v4 }
 0x881   : > { %1851 = vmatpush3.bf16.msra.mxu1 %v1912_v28  ;;  %v1940_v28 = vld [vmem:[%s2390_s4] sm:$0xff]  }
 0x882   : > { %1852 = vmatprep.subr.bf16.mxu1 %v1987_v4 }
 0x885   : > { %1853 = vmatpush3.bf16.msra.mxu1 %v1913_v29  ;;  %v1941_v29 = vld [vmem:[%s2390_s4 + $0x48] sm:$0xff]  }
 0x886   : > { %1854 = vmatprep.subr.bf16.mxu1 %v1987_v4  ;;  %v1104_v4 = vsel %vm531_vm4, %v2186_v23, %v1094_v41  ;;  %v1951_v41 = vld [vmem:[%s2390_s4 + $0x70] sm:$0xff]  }
 0x889   : > { %1855 = vmatpush3.bf16.msra.mxu1 %v1914_v30  ;;  %v1942_v30 = vld [vmem:[%s2390_s4 + $0x8] sm:$0xff]  }
 0x88a   : > { %1754 = vmatprep.subr.bf16.mxu1 %v1939_v26 }
 0x93f   : > { %v947_v31 = vpop.f32.mrb[4].mxu1 }
 0x940   : > { %1097 = vrot.lane.b32.xlu1 %v947_v31, %s1992_s16  ;;  %v1827_v32 = vpop.f32.mrb[5].mxu1  ;;  %v1943_v31 = vld [vmem:[%s2390_s4 + $0x50] sm:$0xff]   ;;  %s246_s16 = scalar_lea.vmem %s2392_s6, %s1640_s23 }
 0x941   : > { %v950_v33 = vpop.f32.mrb[6].mxu1  ;;  %v1944_v32 = vld [vmem:[%s2390_s4 + $0x10] sm:$0xff]  }
 0x942   : > { %v1828_v34 = vpop.f32.mrb[7].mxu1  ;;  %v1945_v33 = vld [vmem:[%s2390_s4 + $0x58] sm:$0xff]  }
 0x943   : > { %v1086_v35 = vpop.f32.mrb[20].mxu0  ;;  %v1946_v34 = vld [vmem:[%s2390_s4 + $0x18] sm:$0xff]  }
 0x944   : > { %1101 = vrot.lane.b32.xlu1 %v1086_v35, %s1991_s15  ;;  %v1838_v36 = vpop.f32.mrb[21].mxu0  ;;  %v1947_v35 = vld [vmem:[%s2390_s4 + $0x60] sm:$0xff]  }
 0x945   : > { %v1089_v38 = vpop.f32.mrb[22].mxu0  ;;  %v1948_v36 = vld [vmem:[%s2390_s4 + $0x20] sm:$0xff]  }
 0x946   : > { %v1839_v40 = vpop.f32.mrb[23].mxu0  ;;  %v1949_v38 = vld [vmem:[%s2390_s4 + $0x68] sm:$0xff]  }
 0x947   : > { %v1950_v40 = vld [vmem:[%s2390_s4 + $0x28] sm:$0xff]  }
 0x9b2   : > { %v1098_v42 = vpop.permute.xlu1 %1097 }
 0x9b3   : > { %v1106_v43 = vsel %vm1105_vm7, %v1104_v4, %v1098_v42  ;;  %v1952_v42 = vld [vmem:[%s2390_s4 + $0x30] sm:$0xff]   ;;  %v1953_v4 = vld [vmem:[%s2390_s4 + $0x78] sm:$0xff]  }
 0x9b6   : > { %v1102_v44 = vpop.permute.xlu1 %1101 }
 0x9b7   : > { %v1108_v45 = vsel %vm1107_vm8, %v1106_v43, %v1102_v44  ;;  %v1954_v43 = vld [vmem:[%s2390_s4 + $0x38] sm:$0xff]   ;;  %v1261_v44 = vsub.s32 6, %v2136_v37 }
 0x9b8   : > { %v1109_v46 = vpack.c.bf16 %v1108_v45, %v1108_v45 }
 0x9b9   : > { %v1262_v45 = vrot.slane %v2142_v39, %v1261_v44 }
 0x9ba   : > { %1857 = vmatmul.mubr.bf16.vlgmr.msra.gmra.mrb[8].mxu1 %v1109_v46  ;;  %v1266_v46 = vrot.slane %v2158_v50, %v1261_v44 }
 0x9bb   : > { %1755 = vmatpush3.bf16.msra.mxu1 %v1940_v28 }
 0x9bc   : > { %1756 = vmatprep.subr.bf16.mxu1 %v1941_v29 }
 0x9bf   : > { %1757 = vmatpush3.bf16.msra.mxu1 %v1942_v30 }
 0x9c0   : > { %1758 = vmatprep.subr.bf16.mxu1 %v1943_v31 }
 0x9c3   : > { %1759 = vmatpush3.bf16.msra.mxu1 %v1944_v32 }
 0x9c4   : > { %1760 = vmatprep.subr.bf16.mxu1 %v1945_v33 }
 0x9c7   : > { %1761 = vmatpush3.bf16.msra.mxu1 %v1946_v34 }
 0x9c8   : > { %1762 = vmatprep.subr.bf16.mxu1 %v1947_v35 }
 0x9cb   : > { %1763 = vmatpush3.bf16.msra.mxu1 %v1948_v36 }
 0x9cc   : > { %1764 = vmatprep.subr.bf16.mxu1 %v1949_v38 }
 0x9cf   : > { %1765 = vmatpush3.bf16.msra.mxu1 %v1950_v40 }
 0x9d0   : > { %1766 = vmatprep.subr.bf16.mxu1 %v1951_v41 }
 0x9d3   : > { %1767 = vmatpush3.bf16.msra.mxu1 %v1952_v42 }
 0x9d4   : > { %1768 = vmatprep.subr.bf16.mxu1 %v1953_v4 }
 0x9d7   : > { %1769 = vmatpush3.bf16.msra.mxu1 %v1954_v43 }
 0xa8d   : > { %v1212_v49 = vpop.f32.mrb[8].mxu1 }
 0xa8e   : > { %v1213_v51 = vadd.f32 %v1212_v49, %v1129_v48  ;;  %v1858_v52 = vpop.f32.mrb[9].mxu1 }
 0xa8f   : > { %v1215_v53 = vpop.f32.mrb[10].mxu1 }
 0xa90   : > { %v2266_v54 = vadd.f32 %v1213_v51, %v2045_v0  ;;  %v1859_v55 = vpop.f32.mrb[11].mxu1  ;;  %v1918_v0 = vld [vmem:[%s2389_s3 + $0x10] ss:$8 sps:$4 sm:$0xff]  }
 0xa91   : > { %1350 = vmatpush1.bf16.msra.mxu0 %v1918_v0 }
 0xa92   : > { %v1219_v23 = vsel %vm252_vm0, %v2266_v54, 0.0  ;;  %1351 = vmatprep.subr.bf16.mxu0 %v1923_v59 }
 0xa93   : > { %1220 = vadd.xlane.f32.xlu0 %v1219_v23 }
 0xa95   : > { %1352 = vmatpush1.bf16.msra.mxu0 %v1921_v60 }
 0xa96   : > { %1353 = vmatprep.subr.bf16.mxu0 %v1926_v6 }
 0xa99   : > { %1354 = vmatpush1.bf16.msra.mxu0 %v1924_v7 }
 0xa9a   : > { %1355 = vmatprep.subr.bf16.mxu0 %v1929_v8 }
 0xa9d   : > { %1356 = vmatpush1.bf16.msra.mxu0 %v1927_v9 }
 0xa9e   : > { %1357 = vmatprep.subr.bf16.mxu0 %v1932_v10 }
 0xaa1   : > { %1358 = vmatpush1.bf16.msra.mxu0 %v1930_v11 }
 0xaa2   : > { %1359 = vmatprep.subr.bf16.mxu0 %v1935_v12  ;;  %v1442_v12 = vsub.s32 7, %v2136_v37 }
 0xaa5   : > { %1360 = vmatpush1.bf16.msra.mxu0 %v1933_v13 }
 0xaa6   : > { %1361 = vmatprep.subr.bf16.mxu0 %v1938_v14  ;;  %v1443_v14 = vrot.slane %v2142_v39, %v1442_v12 }
 0xaa9   : > { %1362 = vmatpush1.bf16.msra.mxu0 %v1936_v15 }
 0xb20   : > { %v1221_v61 = vpop.xlane.xlu0 %1220 }
 0xb21   : > { %v1222_v62 = vmul.f32 0.0078125, %v1221_v61 }
 0xb23   : > { %v1223_v63 = vsub.f32 %v2266_v54, %v1222_v62 }
 0xb25   : > { %v1224_v3 = vmul.f32 %v1223_v63, %v1223_v63 }
 0xb27   : > { %v1225_v5 = vsel %vm252_vm0, %v1224_v3, 0.0 }
 0xb28   : > { %1226 = vadd.xlane.f32.xlu1 %v1225_v5 }
 0xbb5   : > { %v1227_v16 = vpop.xlane.xlu1 %1226 }
 0xbb6   : > { %v1228_v17 = vmul.f32 0.0078125, %v1227_v16 }
 0xbb8   : > { %v1229_v18 = vadd.f32 1e-06, %v1228_v17 }
 0xbba   : > { %1973 = vrsqrt.f32 %v1229_v18 }
 0xbc4   : > { %v1974_v22 = vpop.eup %1973 }
 0xbc5   : > { %v1231_v24 = vmul.f32 %v1974_v22, %v1223_v63 }
 0xbc7   : > { %v1236_v2 = vmul.f32 %v1235_v21, %v1231_v24 }
 0xbc9   : > { %v1241_v25 = vadd.f32 %v1240_v1, %v1236_v2 }
 0xbcb   : > { %v1242_v27 = vpack.c.bf16 %v1241_v25, %v1241_v25 }
 0xbcd   : > { %1380 = vmatmul.mubr.bf16.vlgmr.msra.gmra.mrb[24].mxu0 %v1242_v27 }
 0xca0   : > { %v1381_v47 = vpop.f32.mrb[24].mxu0 }
 0xca1   : > { %v1382_v48 = vadd.f32 %v1381_v47, %v1262_v45  ;;  %v1383_v49 = vpop.f32.mrb[25].mxu0 }
 0xca2   : > { %v1384_v51 = vadd.f32 %v1383_v49, %v1266_v46  ;;  %v1385_v52 = vpop.f32.mrb[26].mxu0 }
 0xca3   : > { %v1388_v53 = vmul.f32 %v1382_v48, %v1382_v48  ;;  %v1386_v55 = vpop.f32.mrb[27].mxu0 }
 0xca4   : > { %v1389_v23 = vmul.f32 %v1384_v51, %v1384_v51 }
 0xca5   : > { %v1390_v56 = vmul.f32 %v1388_v53, %v1382_v48 }
 0xca6   : > { %v1391_v57 = vmul.f32 %v1389_v23, %v1384_v51 }
 0xca7   : > { %v1392_v58 = vmul.f32 0.044715, %v1390_v56 }
 0xca8   : > { %v1393_v0 = vmul.f32 0.044715, %v1391_v57 }
 0xca9   : > { %v1394_v59 = vadd.f32 %v1392_v58, %v1382_v48 }
 0xcaa   : > { %v1395_v60 = vadd.f32 %v1393_v0, %v1384_v51 }
 0xcab   : > { %v1396_v61 = vmul.f32 0.7978846, %v1394_v59 }
 0xcac   : > { %v1397_v62 = vmul.f32 0.7978846, %v1395_v60 }
 0xcad   : > { %1975 = vtanh.f32 %v1396_v61 }
 0xcae   : > { %1977 = vtanh.f32 %v1397_v62 }
 0xcb7   : > { %v1976_v63 = vpop.eup %1975 }
 0xcb8   : > { %v1978_v50 = vpop.eup %1977  ;;  %v1400_v3 = vadd.f32 1.0, %v1976_v63 }
 0xcb9   : > { %v1401_v5 = vadd.f32 1.0, %v1978_v50 }
 0xcba   : > { %v1402_v6 = vmul.f32 0.5, %v1400_v3 }
 0xcbb   : > { %v1403_v7 = vmul.f32 0.5, %v1401_v5 }
 0xcbc   : > { %v1404_v8 = vmul.f32 %v1402_v6, %v1382_v48 }
 0xcbd   : > { %v1405_v9 = vmul.f32 %v1403_v7, %v1384_v51 }
 0xcbe   : > { %v1406_v11 = vpack.c.bf16 %v1404_v8, %v1404_v8 }
 0xcbf   : > { %v1407_v10 = vpack.c.bf16 %v1405_v9, %v1405_v9 }
 0xcc1   : > { %1572 = vmatprep.mubr.bf16.mxu1 %v1407_v10 }
 0xcc2   : > { %1573 = vmatmul.mubr.bf16.vlgmr.msra.gmra.mrb[12].mxu1 %v1406_v11 }
 0xd95   : > { %v1770_v13 = vpop.f32.mrb[12].mxu1 }
 0xd96   : > { %v1771_v15 = vpop.f32.mrb[13].mxu1 }
 0xd97   : > { %v1772_v16 = vadd.f32 %v1771_v15, %v1770_v13  ;;  %v1773_v17 = vpop.f32.mrb[14].mxu1 }
 0xd98   : > { %v1774_v18 = vpop.f32.mrb[15].mxu1 }
 0xd99   : > { %v1575_v19 = vadd.f32 %v1772_v16, %v1443_v14 }
 0xd9b   : > { %v1580_v20 = vadd.f32 %v1575_v19, %v2266_v54 }
 0xd9d   : > { %1581 = vst [vmem:[%s246_s16] sm:$0x1f] %v1580_v20 }
 0xd9e PF: > { %s16_s21 = sadd.s32 1, %s1985_s21  }
 0xd9f   : > { %p13_p4 = scmp.ge.s32.totalorder %s16_s21, 4  }
 0xda1   :  { %15 = sbr.rel (!%p13_p4) target bundleno = 1 (0x1), region = 74 }

</bundles_post_ra>
